<compile_context>
chip_gen: v7x
topology: tpu7x:2x2x1
jax: 0.10.0
libtpu: 0.0.40
codegen_flags: <defaults>
</compile_context>

<pallas_src>
import functools

import numpy as np

import jax
import jax.numpy as jnp
from jax.experimental import pallas as pl
from jax.experimental.pallas import tpu as pltpu


def _round_up(n, m):
    return ((n + m - 1) // m) * m


# ----------------------------------------------------------------------------
# align_corners bilinear interpolation as small constant matrices
# ----------------------------------------------------------------------------
def _interp_matrix(out_size, in_size):
    """(out_size, in_size) row-interp matrix, PyTorch align_corners=True."""
    m = np.zeros((out_size, in_size), np.float32)
    if in_size == 1 or out_size == 1:
        m[:, 0] = 1.0
        return m
    src = np.arange(out_size, dtype=np.float64) * (in_size - 1) / (out_size - 1)
    lo = np.clip(np.floor(src).astype(np.int64), 0, in_size - 1)
    hi = np.minimum(lo + 1, in_size - 1)
    f = (src - lo).astype(np.float32)
    idx = np.arange(out_size)
    m[idx, lo] += 1.0 - f
    m[idx, hi] += f
    return m


def _pad_rows(m, pad):
    """Zero rows added at top/bottom (== zero-padding the upsampled image)."""
    return np.pad(m, ((pad, pad), (0, 0)))


def bilinear_resize_nhwc(x, out_h, out_w):
    """align_corners=True bilinear resize via two interp-matrix contractions."""
    n, h, w, c = x.shape
    rh = jnp.asarray(_interp_matrix(out_h, h))
    rw = jnp.asarray(_interp_matrix(out_w, w))
    y = jnp.einsum("ih,nhwc->niwc", rh, x.astype(jnp.float32))
    return jnp.einsum("jw,niwc->nijc", rw, y)


def _cff_taps(x_low, out_hw):
    """Build the kw-packed tap tensor for the dilated 3x3 conv.

    Performs (bilinear upsample to out_hw) + (pad 2) + (3 column shifts of 2)
    as two einsums with constant matrices.  Output: (n, (Hh+4)*Wh, 3*C) bf16,
    where flat row u*Wh + j holds padded-upsampled pixel (u, j+2*kw) in channel
    group kw (so the kh tap is a contiguous, sublane-aligned row offset).
    """
    n, hl, wl, c = x_low.shape
    hh, wh = out_hw
    ahp = jnp.asarray(_pad_rows(_interp_matrix(hh, hl), 2))           # (Hh+4, Hl)
    awp = _pad_rows(_interp_matrix(wh, wl), 2)                        # (Wh+4, Wl)
    aw_shift = jnp.asarray(np.stack([awp[2 * k:2 * k + wh] for k in range(3)]))
    y = jnp.einsum("ua,nabc->nubc", ahp, x_low.astype(jnp.float32))   # (n,Hh+4,Wl,C)
    taps = jnp.einsum("kjb,nubc->nujkc", aw_shift, y)                 # (n,Hh+4,Wh,3,C)
    return taps.reshape(n, (hh + 4) * wh, 3 * c).astype(jnp.bfloat16)


# ----------------------------------------------------------------------------
# Pallas kernels
# ----------------------------------------------------------------------------
def _cff_cls_kernel(xt_ref, w_ref, b_ref, cls_ref, *, W, HW):
    """conv_low(3x3,d2) folded with conv_low_cls: 3 dots -> nclass map."""
    acc = jnp.zeros((HW, w_ref.shape[2]), jnp.float32)
    for kh in range(3):
        tap = xt_ref[0, pl.ds(2 * kh * W, HW), :]            # (HW, 3*C_low) bf16
        acc = acc + jnp.dot(tap, w_ref[kh],
                            preferred_element_type=jnp.float32)
    cls_ref[0] = (acc + b_ref[...]).astype(cls_ref.dtype)


def _cff_cls_final_kernel(xt_ref, xh_ref, wcat_ref, whigh_ref, bf_ref, bc_ref,
                          wfin_ref, cls_ref, fin_ref, *, W, HW, C_OUT):
    """Full CFF with conv_cls fused; fused map stays on-chip (never stored)."""
    ncat = wcat_ref.shape[2]                                 # C_OUT + ncls_pad
    acc = jnp.zeros((HW, ncat), jnp.float32)
    for kh in range(3):
        tap = xt_ref[0, pl.ds(2 * kh * W, HW), :]            # (HW, 3*C_low) bf16
        acc = acc + jnp.dot(tap, wcat_ref[kh],
                            preferred_element_type=jnp.float32)
    x_high = jnp.dot(xh_ref[0], whigh_ref[...],
                     preferred_element_type=jnp.float32)
    fused = jnp.maximum(acc[:, :C_OUT] + x_high + bf_ref[...], 0.0)
    cls_ref[0] = (acc[:, C_OUT:] + bc_ref[...]).astype(cls_ref.dtype)
    fin = jnp.dot(fused.astype(wfin_ref.dtype), wfin_ref[...],
                  preferred_element_type=jnp.float32)
    fin_ref[0] = fin.astype(fin_ref.dtype)


# ----------------------------------------------------------------------------
# Pallas wrappers
# ----------------------------------------------------------------------------
def cff_cls_forward(kp, x_low, out_hw):
    """CFF whose fused output is unused: returns only the conv_low_cls map."""
    n = x_low.shape[0]
    hh, wh = out_hw
    hw = hh * wh
    x_taps = _cff_taps(x_low, out_hw)
    w, b = kp["w_lowcls"], kp["b_lowcls"]
    ncls_pad = w.shape[2]
    cls = pl.pallas_call(
        functools.partial(_cff_cls_kernel, W=wh, HW=hw),
        grid=(n,),
        in_specs=[pl.BlockSpec((1,) + x_taps.shape[1:], lambda i: (i, 0, 0)),
                  pl.BlockSpec(w.shape, lambda i: (0, 0, 0)),
                  pl.BlockSpec(b.shape, lambda i: (0, 0))],
        out_specs=pl.BlockSpec((1, hw, ncls_pad), lambda i: (i, 0, 0)),
        out_shape=jax.ShapeDtypeStruct((n, hw, ncls_pad), jnp.bfloat16),
        compiler_params=pltpu.CompilerParams(
            dimension_semantics=("parallel",)),
    )(x_taps, w, b)
    return cls.reshape(n, hh, wh, ncls_pad)


def cff_cls_final_forward(kp, x_low, x_high):
    """Full CFF; returns (conv_low_cls map, conv_cls(fused) map), both padded."""
    n, hh, wh, c_high = x_high.shape
    hw = hh * wh
    x_taps = _cff_taps(x_low, (hh, wh))
    xh = x_high.reshape(n, hw, c_high).astype(jnp.bfloat16)
    wcat, whigh = kp["w_cat"], kp["w_high"]
    bf, bc, wfin = kp["b_fused"], kp["b_lowcls"], kp["w_fin"]
    c_out = whigh.shape[1]
    ncls_pad = wfin.shape[1]
    kernel = functools.partial(_cff_cls_final_kernel, W=wh, HW=hw, C_OUT=c_out)
    cls, fin = pl.pallas_call(
        kernel,
        grid=(n,),
        in_specs=[pl.BlockSpec((1,) + x_taps.shape[1:], lambda i: (i, 0, 0)),
                  pl.BlockSpec((1, hw, c_high), lambda i: (i, 0, 0)),
                  pl.BlockSpec(wcat.shape, lambda i: (0, 0, 0)),
                  pl.BlockSpec(whigh.shape, lambda i: (0, 0)),
                  pl.BlockSpec(bf.shape, lambda i: (0, 0)),
                  pl.BlockSpec(bc.shape, lambda i: (0, 0)),
                  pl.BlockSpec(wfin.shape, lambda i: (0, 0))],
        out_specs=(pl.BlockSpec((1, hw, ncls_pad), lambda i: (i, 0, 0)),
                   pl.BlockSpec((1, hw, ncls_pad), lambda i: (i, 0, 0))),
        out_shape=(jax.ShapeDtypeStruct((n, hw, ncls_pad), jnp.bfloat16),
                   jax.ShapeDtypeStruct((n, hw, ncls_pad), jnp.bfloat16)),
        compiler_params=pltpu.CompilerParams(
            dimension_semantics=("parallel",)),
    )(x_taps, xh, wcat, whigh, bf, bc, wfin)
    return (cls.reshape(n, hh, wh, ncls_pad),
            fin.reshape(n, hh, wh, ncls_pad))


# ----------------------------------------------------------------------------
# Parameters: BN folded at init; kernel weights packed/folded once at init.
# ----------------------------------------------------------------------------
def _fold_bn(gamma, beta, mean, var, eps=1e-5):
    s = gamma / jnp.sqrt(var + eps)
    return s, beta - mean * s


def _bn_params(key, c):
    k = jax.random.split(key, 4)
    gamma = 1.0 + 0.1 * jax.random.normal(k[0], (c,), jnp.float32)
    beta = 0.1 * jax.random.normal(k[1], (c,), jnp.float32)
    mean = 0.1 * jax.random.normal(k[2], (c,), jnp.float32)
    var = 1.0 + 0.1 * jnp.abs(jax.random.normal(k[3], (c,), jnp.float32))
    return _fold_bn(gamma, beta, mean, var)


def init_cff(key, c_low, c_high, c_out, nclass):
    """Mathematical (BN-folded, f32) CFF parameters, used by the reference."""
    k = jax.random.split(key, 5)
    # NOTE: real PyTorch weights are (c_out, c_in, kh, kw); transpose to
    # (kh, kw, c_in, c_out) before folding when porting trained weights.
    w_low = 0.05 * jax.random.normal(k[0], (3, 3, c_low, c_out), jnp.float32)
    s_low, b_low = _bn_params(k[1], c_out)
    w_high = 0.05 * jax.random.normal(k[2], (c_high, c_out), jnp.float32)
    s_high, b_high = _bn_params(k[3], c_out)
    w_cls = 0.05 * jax.random.normal(k[4], (c_out, nclass), jnp.float32)
    return dict(w_low=w_low * s_low, b_low=b_low,           # BN scale folded
                w_high=w_high * s_high, b_high=b_high,
                w_cls=w_cls, nclass=nclass)


def pack_cff_cls(p):
    """Kernel params for a CFF whose fused output is unused (cls only)."""
    c_low, c_out = p["w_low"].shape[2], p["w_low"].shape[3]
    nclass = p["nclass"]
    ncls_pad = _round_up(nclass, 128)
    w_cls_p = jnp.pad(p["w_cls"], ((0, 0), (0, ncls_pad - nclass)))
    w_slab = p["w_low"].reshape(3, 3 * c_low, c_out)         # (kh, kw*C, C_out)
    w_lowcls = jnp.einsum("kio,oj->kij", w_slab, w_cls_p)    # conv ∘ cls folded
    b_lowcls = (p["b_low"] @ w_cls_p).reshape(1, ncls_pad)
    return dict(w_lowcls=w_lowcls.astype(jnp.bfloat16), b_lowcls=b_lowcls)


def pack_cff_final(p, conv_cls_w):
    """Kernel params for the CFF that also applies the head-level conv_cls."""
    c_low, c_out = p["w_low"].shape[2], p["w_low"].shape[3]
    nclass = p["nclass"]
    ncls_pad = _round_up(nclass, 128)
    w_cls_p = jnp.pad(p["w_cls"], ((0, 0), (0, ncls_pad - nclass)))
    w_fin_p = jnp.pad(conv_cls_w, ((0, 0), (0, ncls_pad - nclass)))
    w_slab = p["w_low"].reshape(3, 3 * c_low, c_out)
    w_cat = jnp.concatenate(                                  # N-concat: conv | cls
        [w_slab, jnp.einsum("kio,oj->kij", w_slab, w_cls_p)], axis=2)
    return dict(w_cat=w_cat.astype(jnp.bfloat16),
                w_high=p["w_high"].astype(jnp.bfloat16),
                b_fused=(p["b_low"] + p["b_high"]).reshape(1, c_out),
                b_lowcls=(p["b_low"] @ w_cls_p).reshape(1, ncls_pad),
                w_fin=w_fin_p.astype(jnp.bfloat16))


def init_ichead(key, c_sub1, c_sub2, c_sub4, c_out, nclass):
    k = jax.random.split(key, 3)
    cff_24 = init_cff(k[0], c_sub4, c_sub2, c_out, nclass)
    cff_12 = init_cff(k[1], c_sub2, c_sub1, c_out, nclass)
    conv_cls_w = 0.05 * jax.random.normal(k[2], (c_out, nclass), jnp.float32)
    return dict(cff_24=cff_24, cff_12=cff_12, conv_cls_w=conv_cls_w,
                nclass=nclass,
                k24=pack_cff_cls(cff_24),
                k12=pack_cff_final(cff_12, conv_cls_w))


# ----------------------------------------------------------------------------
# _ICHead forward (NCHW in/out, like the PyTorch module)
# ----------------------------------------------------------------------------
def ic_head_forward(params, x_sub1, x_sub2, x_sub4, size):
    nclass = params["nclass"]
    x1 = jnp.transpose(x_sub1, (0, 2, 3, 1))
    x2 = jnp.transpose(x_sub2, (0, 2, 3, 1))
    x4 = jnp.transpose(x_sub4, (0, 2, 3, 1))
    _, h2, w2, _ = x2.shape
    _, h1, w1, _ = x1.shape

    # cff_24: fused output is discarded by the reference forward, so only the
    # conv_low_cls branch is computed (no conv_high / ReLU / fused writeback).
    x24_pad = cff_cls_forward(params["k24"], x4, (h2, w2))
    x_24_cls = x24_pad[..., :nclass].astype(jnp.float32)

    # cff_12 (+ head conv_cls fused in-kernel; 1x1 linear conv commutes with
    # bilinear interpolation, so upsamples run on nclass channels).
    x12_pad, cls12_pad = cff_cls_final_forward(params["k12"], x2, x1)
    x_12_cls = x12_pad[..., :nclass].astype(jnp.float32)
    cls12 = cls12_pad[..., :nclass].astype(jnp.float32)

    up_x2 = bilinear_resize_nhwc(cls12, 2 * h1, 2 * w1)
    up_x8 = bilinear_resize_nhwc(up_x2, size[0], size[1])

    outputs = [x_24_cls, x_12_cls, up_x2, up_x8]
    outputs.reverse()
    return [jnp.transpose(o, (0, 3, 1, 2)) for o in outputs]   # back to NCHW


# ----------------------------------------------------------------------------
# Plain-JAX f32 reference of the whole head (testing only)
# ----------------------------------------------------------------------------
def _cff_reference(p, x_low, x_high):
    n, hh, wh, _ = x_high.shape
    c_out = p["w_low"].shape[3]
    x_up = bilinear_resize_nhwc(x_low, hh, wh)
    xp = jnp.pad(x_up, ((0, 0), (2, 2), (2, 2), (0, 0)))
    acc = jnp.zeros((n, hh, wh, c_out), jnp.float32)
    for kh in range(3):
        for kw in range(3):
            acc = acc + jnp.einsum(
                "nhwc,co->nhwo",
                xp[:, 2 * kh:2 * kh + hh, 2 * kw:2 * kw + wh, :],
                p["w_low"][kh, kw])
    x_low_f = acc + p["b_low"]
    x_high_f = jnp.einsum("nhwc,co->nhwo", x_high, p["w_high"]) + p["b_high"]
    fused = jnp.maximum(x_low_f + x_high_f, 0.0)
    cls = jnp.einsum("nhwc,co->nhwo", x_low_f, p["w_cls"])
    return fused, cls


def ic_head_reference(params, x_sub1, x_sub2, x_sub4, size):
    x1 = jnp.transpose(x_sub1, (0, 2, 3, 1))
    x2 = jnp.transpose(x_sub2, (0, 2, 3, 1))
    x4 = jnp.transpose(x_sub4, (0, 2, 3, 1))
    _, h1, w1, _ = x1.shape
    _, x_24_cls = _cff_reference(params["cff_24"], x4, x2)
    x_cff_12, x_12_cls = _cff_reference(params["cff_12"], x2, x1)
    up = bilinear_resize_nhwc(x_cff_12, 2 * h1, 2 * w1)
    up_x2 = jnp.einsum("nhwc,co->nhwo", up, params["conv_cls_w"])
    up_x8 = bilinear_resize_nhwc(up_x2, size[0], size[1])
    outputs = [x_24_cls, x_12_cls, up_x2, up_x8]
    outputs.reverse()
    return [jnp.transpose(o, (0, 3, 1, 2)) for o in outputs]


# ----------------------------------------------------------------------------
if __name__ == "__main__":
    key = jax.random.PRNGKey(0)

    # cfg.MODEL.BACKBONE_SCALE = 0.0625 -> int(512*s)=32, int(2048*s)=128
    C_SUB1, C_SUB2, C_SUB4 = 64, 32, 128
    C_OUT, NCLASS = 128, 8
    N = 2
    H1, W1 = 16, 16       # x_sub1 spatial
    H2, W2 = 8, 8         # x_sub2 spatial
    H4, W4 = 4, 4         # x_sub4 spatial
    SIZE = (64, 64)       # final upsample target

    k_in, k_p = jax.random.split(key)
    k1, k2, k4 = jax.random.split(k_in, 3)
    x_sub1 = jax.random.normal(k1, (N, C_SUB1, H1, W1), jnp.float32)
    x_sub2 = jax.random.normal(k2, (N, C_SUB2, H2, W2), jnp.float32)
    x_sub4 = jax.random.normal(k4, (N, C_SUB4, H4, W4), jnp.float32)

    params = init_ichead(k_p, C_SUB1, C_SUB2, C_SUB4, C_OUT, NCLASS)

    fwd = jax.jit(lambda a, b, c: ic_head_forward(params, a, b, c, SIZE))
    outs = jax.block_until_ready(fwd(x_sub1, x_sub2, x_sub4))

    expected_shapes = [
        (N, NCLASS, SIZE[0], SIZE[1]),   # up_x8
        (N, NCLASS, 2 * H1, 2 * W1),     # up_x2
        (N, NCLASS, H1, W1),             # x_12_cls
        (N, NCLASS, H2, W2),             # x_24_cls
    ]
    assert [tuple(o.shape) for o in outs] == expected_shapes
    assert all(bool(jnp.all(jnp.isfinite(o))) for o in outs)

    # Correctness vs plain-JAX f32 reference of the full head (tolerance
    # reflects bf16 MXU operands with f32 accumulation).
    refs = ic_head_reference(params, x_sub1, x_sub2, x_sub4, SIZE)
    for o, r in zip(outs, refs):
        assert o.shape == r.shape
        assert jnp.allclose(o, r, atol=5e-2, rtol=5e-2), float(
            jnp.max(jnp.abs(o - r)))

    print("KERNEL_OK")
</pallas_src>

<mosaic_0001>
module attributes {stable_mosaic.version = 11 : i64} {
  func.func @_cff_cls_final_kernel(%arg0: i32, %arg1: memref<1x320x96xbf16, #tpu.memory_space<vmem>>, %arg2: memref<1x256x64xbf16, #tpu.memory_space<vmem>>, %arg3: memref<3x96x256xbf16, #tpu.memory_space<vmem>>, %arg4: memref<64x128xbf16, #tpu.memory_space<vmem>>, %arg5: memref<1x128xf32, #tpu.memory_space<vmem>>, %arg6: memref<1x128xf32, #tpu.memory_space<vmem>>, %arg7: memref<128x128xbf16, #tpu.memory_space<vmem>>, %arg8: memref<1x256x128xbf16, #tpu.memory_space<vmem>>, %arg9: memref<1x256x128xbf16, #tpu.memory_space<vmem>>) attributes {dimension_semantics = [#tpu.dimension_semantics<parallel>], iteration_bounds = array<i64: 2>, scalar_prefetch = 0 : i64, scratch_operands = 0 : i64, tpu.core_type = #tpu.core_type<tc>, window_params = [{transform_indices = @transform_0, window_bounds = array<i64: 1, 320, 96>}, {transform_indices = @transform_1, window_bounds = array<i64: 1, 256, 64>}, {pipeline_mode = #tpu.pipeline_mode<synchronous>, transform_indices = @transform_2, window_bounds = array<i64: 3, 96, 256>}, {pipeline_mode = #tpu.pipeline_mode<synchronous>, transform_indices = @transform_3, window_bounds = array<i64: 64, 128>}, {pipeline_mode = #tpu.pipeline_mode<synchronous>, transform_indices = @transform_4, window_bounds = array<i64: 1, 128>}, {pipeline_mode = #tpu.pipeline_mode<synchronous>, transform_indices = @transform_5, window_bounds = array<i64: 1, 128>}, {pipeline_mode = #tpu.pipeline_mode<synchronous>, transform_indices = @transform_6, window_bounds = array<i64: 128, 128>}, {transform_indices = @transform_7, window_bounds = array<i64: 1, 256, 128>}, {transform_indices = @transform_8, window_bounds = array<i64: 1, 256, 128>}]} {
    %cst = arith.constant 0.000000e+00 : f32
    %0 = vector.broadcast %cst : f32 to vector<256x256xf32>
    %c0 = arith.constant 0 : index
    %c0_0 = arith.constant 0 : index
    %c0_1 = arith.constant 0 : index
    %1 = vector.load %arg1[%c0, %c0_0, %c0_1] : memref<1x320x96xbf16, #tpu.memory_space<vmem>>, vector<1x256x96xbf16>
    %2 = vector.shape_cast %1 : vector<1x256x96xbf16> to vector<256x96xbf16>
    %c0_2 = arith.constant 0 : index
    %c0_3 = arith.constant 0 : index
    %c0_4 = arith.constant 0 : index
    %3 = vector.load %arg3[%c0_2, %c0_3, %c0_4] : memref<3x96x256xbf16, #tpu.memory_space<vmem>>, vector<1x96x256xbf16>
    %4 = vector.shape_cast %3 : vector<1x96x256xbf16> to vector<96x256xbf16>
    %cst_5 = arith.constant dense<0.000000e+00> : vector<256x256xf32>
    %5 = tpu.matmul %2, %4, %cst_5 {dimension_numbers = #tpu.dot_dimension_numbers<[1], [0], [0], [1], [0, 0, 1, 1], [], []>} : vector<256x96xbf16>, vector<96x256xbf16>, vector<256x256xf32> -> vector<256x256xf32>
    %6 = arith.addf %0, %5 : vector<256x256xf32>
    %c0_6 = arith.constant 0 : index
    %c32 = arith.constant 32 : index
    %c0_7 = arith.constant 0 : index
    %7 = vector.load %arg1[%c0_6, %c32, %c0_7] : memref<1x320x96xbf16, #tpu.memory_space<vmem>>, vector<1x256x96xbf16>
    %8 = vector.shape_cast %7 : vector<1x256x96xbf16> to vector<256x96xbf16>
    %c1 = arith.constant 1 : index
    %c0_8 = arith.constant 0 : index
    %c0_9 = arith.constant 0 : index
    %9 = vector.load %arg3[%c1, %c0_8, %c0_9] : memref<3x96x256xbf16, #tpu.memory_space<vmem>>, vector<1x96x256xbf16>
    %10 = vector.shape_cast %9 : vector<1x96x256xbf16> to vector<96x256xbf16>
    %cst_10 = arith.constant dense<0.000000e+00> : vector<256x256xf32>
    %11 = tpu.matmul %8, %10, %cst_10 {dimension_numbers = #tpu.dot_dimension_numbers<[1], [0], [0], [1], [0, 0, 1, 1], [], []>} : vector<256x96xbf16>, vector<96x256xbf16>, vector<256x256xf32> -> vector<256x256xf32>
    %12 = arith.addf %6, %11 : vector<256x256xf32>
    %c0_11 = arith.constant 0 : index
    %c64 = arith.constant 64 : index
    %c0_12 = arith.constant 0 : index
    %13 = vector.load %arg1[%c0_11, %c64, %c0_12] : memref<1x320x96xbf16, #tpu.memory_space<vmem>>, vector<1x256x96xbf16>
    %14 = vector.shape_cast %13 : vector<1x256x96xbf16> to vector<256x96xbf16>
    %c2 = arith.constant 2 : index
    %c0_13 = arith.constant 0 : index
    %c0_14 = arith.constant 0 : index
    %15 = vector.load %arg3[%c2, %c0_13, %c0_14] : memref<3x96x256xbf16, #tpu.memory_space<vmem>>, vector<1x96x256xbf16>
    %16 = vector.shape_cast %15 : vector<1x96x256xbf16> to vector<96x256xbf16>
    %cst_15 = arith.constant dense<0.000000e+00> : vector<256x256xf32>
    %17 = tpu.matmul %14, %16, %cst_15 {dimension_numbers = #tpu.dot_dimension_numbers<[1], [0], [0], [1], [0, 0, 1, 1], [], []>} : vector<256x96xbf16>, vector<96x256xbf16>, vector<256x256xf32> -> vector<256x256xf32>
    %18 = arith.addf %12, %17 : vector<256x256xf32>
    %c0_16 = arith.constant 0 : index
    %c0_17 = arith.constant 0 : index
    %c0_18 = arith.constant 0 : index
    %19 = vector.load %arg2[%c0_16, %c0_17, %c0_18] : memref<1x256x64xbf16, #tpu.memory_space<vmem>>, vector<1x256x64xbf16>
    %20 = vector.shape_cast %19 : vector<1x256x64xbf16> to vector<256x64xbf16>
    %c0_19 = arith.constant 0 : index
    %c0_20 = arith.constant 0 : index
    %21 = vector.load %arg4[%c0_19, %c0_20] : memref<64x128xbf16, #tpu.memory_space<vmem>>, vector<64x128xbf16>
    %cst_21 = arith.constant dense<0.000000e+00> : vector<256x128xf32>
    %22 = tpu.matmul %20, %21, %cst_21 {dimension_numbers = #tpu.dot_dimension_numbers<[1], [0], [0], [1], [0, 0, 1, 1], [], []>} : vector<256x64xbf16>, vector<64x128xbf16>, vector<256x128xf32> -> vector<256x128xf32>
    %23 = vector.extract_strided_slice %18 {offsets = [0, 0], sizes = [256, 128], strides = [1, 1]} : vector<256x256xf32> to vector<256x128xf32>
    %24 = arith.addf %23, %22 : vector<256x128xf32>
    %c0_22 = arith.constant 0 : index
    %c0_23 = arith.constant 0 : index
    %25 = vector.load %arg5[%c0_22, %c0_23] : memref<1x128xf32, #tpu.memory_space<vmem>>, vector<1x128xf32>
    %26 = vector.broadcast %25 : vector<1x128xf32> to vector<256x128xf32>
    %27 = arith.addf %24, %26 : vector<256x128xf32>
    %cst_24 = arith.constant 0.000000e+00 : f32
    %28 = vector.broadcast %cst_24 : f32 to vector<256x128xf32>
    %29 = arith.maximumf %27, %28 : vector<256x128xf32>
    %30 = vector.extract_strided_slice %18 {offsets = [0, 128], sizes = [256, 128], strides = [1, 1]} : vector<256x256xf32> to vector<256x128xf32>
    %c0_25 = arith.constant 0 : index
    %c0_26 = arith.constant 0 : index
    %31 = vector.load %arg6[%c0_25, %c0_26] : memref<1x128xf32, #tpu.memory_space<vmem>>, vector<1x128xf32>
    %32 = vector.broadcast %31 : vector<1x128xf32> to vector<256x128xf32>
    %33 = arith.addf %30, %32 : vector<256x128xf32>
    %34 = arith.truncf %33 : vector<256x128xf32> to vector<256x128xbf16>
    %c0_27 = arith.constant 0 : index
    %c0_28 = arith.constant 0 : index
    %c0_29 = arith.constant 0 : index
    %35 = vector.load %arg8[%c0_27, %c0_28, %c0_29] : memref<1x256x128xbf16, #tpu.memory_space<vmem>>, vector<1x256x128xbf16>
    %36 = vector.shape_cast %35 : vector<1x256x128xbf16> to vector<256x128xbf16>
    %37 = vector.shape_cast %34 : vector<256x128xbf16> to vector<1x256x128xbf16>
    tpu.vector_store %arg8[%c0_27, %c0_28, %c0_29], %37 {strides = array<i32>} : memref<1x256x128xbf16, #tpu.memory_space<vmem>>, vector<1x256x128xbf16>,
    %38 = arith.truncf %29 : vector<256x128xf32> to vector<256x128xbf16>
    %c0_30 = arith.constant 0 : index
    %c0_31 = arith.constant 0 : index
    %39 = vector.load %arg7[%c0_30, %c0_31] : memref<128x128xbf16, #tpu.memory_space<vmem>>, vector<128x128xbf16>
    %cst_32 = arith.constant dense<0.000000e+00> : vector<256x128xf32>
    %40 = tpu.matmul %38, %39, %cst_32 {dimension_numbers = #tpu.dot_dimension_numbers<[1], [0], [0], [1], [0, 0, 1, 1], [], []>} : vector<256x128xbf16>, vector<128x128xbf16>, vector<256x128xf32> -> vector<256x128xf32>
    %41 = arith.truncf %40 : vector<256x128xf32> to vector<256x128xbf16>
    %c0_33 = arith.constant 0 : index
    %c0_34 = arith.constant 0 : index
    %c0_35 = arith.constant 0 : index
    %42 = vector.load %arg9[%c0_33, %c0_34, %c0_35] : memref<1x256x128xbf16, #tpu.memory_space<vmem>>, vector<1x256x128xbf16>
    %43 = vector.shape_cast %42 : vector<1x256x128xbf16> to vector<256x128xbf16>
    %44 = vector.shape_cast %41 : vector<256x128xbf16> to vector<1x256x128xbf16>
    tpu.vector_store %arg9[%c0_33, %c0_34, %c0_35], %44 {strides = array<i32>} : memref<1x256x128xbf16, #tpu.memory_space<vmem>>, vector<1x256x128xbf16>,
    return
  }
  func.func @transform_0(%arg0: i32) -> (i32, i32, i32) {
    %c0_i32 = arith.constant 0 : i32
    %c0_i32_0 = arith.constant 0 : i32
    %c0_i32_1 = arith.constant 0 : i32
    return %arg0, %c0_i32, %c0_i32_0 : i32, i32, i32
  }
  func.func @transform_1(%arg0: i32) -> (i32, i32, i32) {
    %c0_i32 = arith.constant 0 : i32
    %c0_i32_0 = arith.constant 0 : i32
    %c0_i32_1 = arith.constant 0 : i32
    return %arg0, %c0_i32, %c0_i32_0 : i32, i32, i32
  }
  func.func @transform_2(%arg0: i32) -> (i32, i32, i32) {
    %c0_i32 = arith.constant 0 : i32
    %c0_i32_0 = arith.constant 0 : i32
    %c0_i32_1 = arith.constant 0 : i32
    %c0_i32_2 = arith.constant 0 : i32
    return %c0_i32, %c0_i32_0, %c0_i32_1 : i32, i32, i32
  }
  func.func @transform_3(%arg0: i32) -> (i32, i32) {
    %c0_i32 = arith.constant 0 : i32
    %c0_i32_0 = arith.constant 0 : i32
    %c0_i32_1 = arith.constant 0 : i32
    return %c0_i32, %c0_i32_0 : i32, i32
  }
  func.func @transform_4(%arg0: i32) -> (i32, i32) {
    %c0_i32 = arith.constant 0 : i32
    %c0_i32_0 = arith.constant 0 : i32
    %c0_i32_1 = arith.constant 0 : i32
    return %c0_i32, %c0_i32_0 : i32, i32
  }
  func.func @transform_5(%arg0: i32) -> (i32, i32) {
    %c0_i32 = arith.constant 0 : i32
    %c0_i32_0 = arith.constant 0 : i32
    %c0_i32_1 = arith.constant 0 : i32
    return %c0_i32, %c0_i32_0 : i32, i32
  }
  func.func @transform_6(%arg0: i32) -> (i32, i32) {
    %c0_i32 = arith.constant 0 : i32
    %c0_i32_0 = arith.constant 0 : i32
    %c0_i32_1 = arith.constant 0 : i32
    return %c0_i32, %c0_i32_0 : i32, i32
  }
  func.func @transform_7(%arg0: i32) -> (i32, i32, i32) {
    %c0_i32 = arith.constant 0 : i32
    %c0_i32_0 = arith.constant 0 : i32
    %c0_i32_1 = arith.constant 0 : i32
    return %arg0, %c0_i32, %c0_i32_0 : i32, i32, i32
  }
  func.func @transform_8(%arg0: i32) -> (i32, i32, i32) {
    %c0_i32 = arith.constant 0 : i32
    %c0_i32_0 = arith.constant 0 : i32
    %c0_i32_1 = arith.constant 0 : i32
    return %arg0, %c0_i32, %c0_i32_0 : i32, i32, i32
  }
}

module attributes {stable_mosaic.version = 11 : i64} {
  func.func @_cff_cls_kernel(%arg0: i32, %arg1: memref<1x96x384xbf16, #tpu.memory_space<vmem>>, %arg2: memref<3x384x128xbf16, #tpu.memory_space<vmem>>, %arg3: memref<1x128xf32, #tpu.memory_space<vmem>>, %arg4: memref<1x64x128xbf16, #tpu.memory_space<vmem>>) attributes {dimension_semantics = [#tpu.dimension_semantics<parallel>], iteration_bounds = array<i64: 2>, scalar_prefetch = 0 : i64, scratch_operands = 0 : i64, tpu.core_type = #tpu.core_type<tc>, window_params = [{transform_indices = @transform_0, window_bounds = array<i64: 1, 96, 384>}, {pipeline_mode = #tpu.pipeline_mode<synchronous>, transform_indices = @transform_1, window_bounds = array<i64: 3, 384, 128>}, {pipeline_mode = #tpu.pipeline_mode<synchronous>, transform_indices = @transform_2, window_bounds = array<i64: 1, 128>}, {transform_indices = @transform_3, window_bounds = array<i64: 1, 64, 128>}]} {
    %cst = arith.constant 0.000000e+00 : f32
    %0 = vector.broadcast %cst : f32 to vector<64x128xf32>
    %c0 = arith.constant 0 : index
    %c0_0 = arith.constant 0 : index
    %c0_1 = arith.constant 0 : index
    %1 = vector.load %arg1[%c0, %c0_0, %c0_1] : memref<1x96x384xbf16, #tpu.memory_space<vmem>>, vector<1x64x384xbf16>
    %2 = vector.shape_cast %1 : vector<1x64x384xbf16> to vector<64x384xbf16>
    %c0_2 = arith.constant 0 : index
    %c0_3 = arith.constant 0 : index
    %c0_4 = arith.constant 0 : index
    %3 = vector.load %arg2[%c0_2, %c0_3, %c0_4] : memref<3x384x128xbf16, #tpu.memory_space<vmem>>, vector<1x384x128xbf16>
    %4 = vector.shape_cast %3 : vector<1x384x128xbf16> to vector<384x128xbf16>
    %cst_5 = arith.constant dense<0.000000e+00> : vector<64x128xf32>
    %5 = tpu.matmul %2, %4, %cst_5 {dimension_numbers = #tpu.dot_dimension_numbers<[1], [0], [0], [1], [0, 0, 1, 1], [], []>} : vector<64x384xbf16>, vector<384x128xbf16>, vector<64x128xf32> -> vector<64x128xf32>
    %6 = arith.addf %0, %5 : vector<64x128xf32>
    %c0_6 = arith.constant 0 : index
    %c16 = arith.constant 16 : index
    %c0_7 = arith.constant 0 : index
    %7 = vector.load %arg1[%c0_6, %c16, %c0_7] : memref<1x96x384xbf16, #tpu.memory_space<vmem>>, vector<1x64x384xbf16>
    %8 = vector.shape_cast %7 : vector<1x64x384xbf16> to vector<64x384xbf16>
    %c1 = arith.constant 1 : index
    %c0_8 = arith.constant 0 : index
    %c0_9 = arith.constant 0 : index
    %9 = vector.load %arg2[%c1, %c0_8, %c0_9] : memref<3x384x128xbf16, #tpu.memory_space<vmem>>, vector<1x384x128xbf16>
    %10 = vector.shape_cast %9 : vector<1x384x128xbf16> to vector<384x128xbf16>
    %cst_10 = arith.constant dense<0.000000e+00> : vector<64x128xf32>
    %11 = tpu.matmul %8, %10, %cst_10 {dimension_numbers = #tpu.dot_dimension_numbers<[1], [0], [0], [1], [0, 0, 1, 1], [], []>} : vector<64x384xbf16>, vector<384x128xbf16>, vector<64x128xf32> -> vector<64x128xf32>
    %12 = arith.addf %6, %11 : vector<64x128xf32>
    %c0_11 = arith.constant 0 : index
    %c32 = arith.constant 32 : index
    %c0_12 = arith.constant 0 : index
    %13 = vector.load %arg1[%c0_11, %c32, %c0_12] : memref<1x96x384xbf16, #tpu.memory_space<vmem>>, vector<1x64x384xbf16>
    %14 = vector.shape_cast %13 : vector<1x64x384xbf16> to vector<64x384xbf16>
    %c2 = arith.constant 2 : index
    %c0_13 = arith.constant 0 : index
    %c0_14 = arith.constant 0 : index
    %15 = vector.load %arg2[%c2, %c0_13, %c0_14] : memref<3x384x128xbf16, #tpu.memory_space<vmem>>, vector<1x384x128xbf16>
    %16 = vector.shape_cast %15 : vector<1x384x128xbf16> to vector<384x128xbf16>
    %cst_15 = arith.constant dense<0.000000e+00> : vector<64x128xf32>
    %17 = tpu.matmul %14, %16, %cst_15 {dimension_numbers = #tpu.dot_dimension_numbers<[1], [0], [0], [1], [0, 0, 1, 1], [], []>} : vector<64x384xbf16>, vector<384x128xbf16>, vector<64x128xf32> -> vector<64x128xf32>
    %18 = arith.addf %12, %17 : vector<64x128xf32>
    %c0_16 = arith.constant 0 : index
    %c0_17 = arith.constant 0 : index
    %19 = vector.load %arg3[%c0_16, %c0_17] : memref<1x128xf32, #tpu.memory_space<vmem>>, vector<1x128xf32>
    %20 = vector.broadcast %19 : vector<1x128xf32> to vector<64x128xf32>
    %21 = arith.addf %18, %20 : vector<64x128xf32>
    %22 = arith.truncf %21 : vector<64x128xf32> to vector<64x128xbf16>
    %c0_18 = arith.constant 0 : index
    %c0_19 = arith.constant 0 : index
    %c0_20 = arith.constant 0 : index
    %23 = vector.load %arg4[%c0_18, %c0_19, %c0_20] : memref<1x64x128xbf16, #tpu.memory_space<vmem>>, vector<1x64x128xbf16>
    %24 = vector.shape_cast %23 : vector<1x64x128xbf16> to vector<64x128xbf16>
    %25 = vector.shape_cast %22 : vector<64x128xbf16> to vector<1x64x128xbf16>
    tpu.vector_store %arg4[%c0_18, %c0_19, %c0_20], %25 {strides = array<i32>} : memref<1x64x128xbf16, #tpu.memory_space<vmem>>, vector<1x64x128xbf16>,
    return
  }
  func.func @transform_0(%arg0: i32) -> (i32, i32, i32) {
    %c0_i32 = arith.constant 0 : i32
    %c0_i32_0 = arith.constant 0 : i32
    %c0_i32_1 = arith.constant 0 : i32
    return %arg0, %c0_i32, %c0_i32_0 : i32, i32, i32
  }
  func.func @transform_1(%arg0: i32) -> (i32, i32, i32) {
    %c0_i32 = arith.constant 0 : i32
    %c0_i32_0 = arith.constant 0 : i32
    %c0_i32_1 = arith.constant 0 : i32
    %c0_i32_2 = arith.constant 0 : i32
    return %c0_i32, %c0_i32_0, %c0_i32_1 : i32, i32, i32
  }
  func.func @transform_2(%arg0: i32) -> (i32, i32) {
    %c0_i32 = arith.constant 0 : i32
    %c0_i32_0 = arith.constant 0 : i32
    %c0_i32_1 = arith.constant 0 : i32
    return %c0_i32, %c0_i32_0 : i32, i32
  }
  func.func @transform_3(%arg0: i32) -> (i32, i32, i32) {
    %c0_i32 = arith.constant 0 : i32
    %c0_i32_0 = arith.constant 0 : i32
    %c0_i32_1 = arith.constant 0 : i32
    return %arg0, %c0_i32, %c0_i32_0 : i32, i32, i32
  }
}

</mosaic_0001>

<bundles_post_ra>
// kernel: _lambda_.3
= control target key start
LH: loop header
LB: loop body
LE: loop exit
PB: predicated region body
PF: predicated region fallthrough
CT: control target
= control target key end

     0   :  { %s3375_s27 = smov 0   ;;  %s4085_s0 = inlined_call_operand.vmem [shape: bf16[2,320,96], index: 0, kind: input, shape index: {}]   ;;  %s4086_s1 = inlined_call_operand.vmem [shape: bf16[2,256,64], index: 1, kind: input, shape index: {}]   ;;  %s4087_s2 = inlined_call_operand.vmem [shape: bf16[3,96,256], index: 2, kind: input, shape index: {}]   ;;  %s4088_s3 = inlined_call_operand.vmem [shape: bf16[64,128], index: 3, kind: input, shape index: {}]   ;;  %s4089_s4 = inlined_call_operand.vmem [shape: f32[1,128], index: 4, kind: input, shape index: {}]   ;;  %s4090_s5 = inlined_call_operand.vmem [shape: f32[1,128], index: 5, kind: input, shape index: {}]   ;;  %s4091_s6 = inlined_call_operand.vmem [shape: bf16[128,128], index: 6, kind: input, shape index: {}]   ;;  %s4092_s7 = inlined_call_operand.vmem [shape: bf16[2,256,128], index: 7, kind: output, shape index: {0}]   ;;  %s4093_s8 = inlined_call_operand.vmem [shape: bf16[2,256,128], index: 8, kind: output, shape index: {1}]  }
   0x1 LB: > { %s2571_s28 = sadd.s32 4294967295, %s3327_s27   ;;  %p2575_p0 = scmp.ge.s32.totalorder %s3327_s27, 1  ;;  %s3327_s27 = sphi %s3375_s27, %s19_s27  }
   0x2   : > { %p275_p1 = scmp.lt.s32.totalorder %s3327_s27, 3 }
   0x4   : > { %p276_p2 = pnand %p2575_p0, %p275_p1 }
   0x6   : > { %279 = sbr.rel (%p276_p2) target bundleno = 729 (0x2d9), region = 48 }
   0xd   : > { %v3205_v0 = vld [vmem:[%s4087_s2 + $0x4] ss:$8 sps:$4 sm:$0xff]   ;;  %v3329_v2 = vmov 0   ;;  %v3209_v3 = vld [vmem:[%s4087_s2] ss:$8 sps:$4 sm:$0xff]   ;;  %p319_p3 = scmp.lt.s32.totalorder %s2571_s28, 1 }
   0xe   : > { %v3207_v1 = vld [vmem:[%s4087_s2 + $0x64] ss:$8 sps:$4 sm:$0xff]   ;;  %891 = vmatprep.mubr.bf16.mxu0 %v3329_v2  ;;  %622 = vmatprep.mubr.bf16.mxu1 %v3329_v2  ;;  %v3210_v4 = vld [vmem:[%s4087_s2 + $0x60] ss:$8 sps:$4 sm:$0xff]   ;;  %v3211_v5 = vld [vmem:[%s4087_s2 + $0x14] ss:$8 sps:$4 sm:$0xff]  }
   0xf   : > { %859 = vmatprep.subr.bf16.mxu0 %v3205_v0  ;;  %590 = vmatprep.subr.bf16.mxu1 %v3207_v1  ;;  %v3213_v6 = vld [vmem:[%s4087_s2 + $0x74] ss:$8 sps:$4 sm:$0xff]   ;;  %v3215_v7 = vld [vmem:[%s4087_s2 + $0x10] ss:$8 sps:$4 sm:$0xff]   ;;  %v3217_v9 = vld [vmem:[%s4087_s2 + $0x24] ss:$8 sps:$4 sm:$0xff]  }
  0x10   : > { %860 = vmatpush1.bf16.msra.mxu0 %v3209_v3  ;;  %591 = vmatpush1.bf16.msra.mxu1 %v3210_v4  ;;  %v3216_v8 = vld [vmem:[%s4087_s2 + $0x70] ss:$8 sps:$4 sm:$0xff]   ;;  %s4135_s28 = smov (!%p319_p3, %s2571_s28), 1  ;;  %v3219_v10 = vld [vmem:[%s4087_s2 + $0x84] ss:$8 sps:$4 sm:$0xff]   ;;  %vm541_vm0 = vcmask 785408  }
  0x11   : > { %861 = vmatprep.subr.bf16.mxu0 %v3211_v5  ;;  %592 = vmatprep.subr.bf16.mxu1 %v3213_v6  ;;  %v3221_v11 = vld [vmem:[%s4087_s2 + $0x20] ss:$8 sps:$4 sm:$0xff]   ;;  %v3223_v13 = vld [vmem:[%s4087_s2 + $0x34] ss:$8 sps:$4 sm:$0xff]   ;;  %v3227_v15 = vld [vmem:[%s4087_s2 + $0x30] ss:$8 sps:$4 sm:$0xff]  }
  0x12   : > { %v3222_v12 = vld [vmem:[%s4087_s2 + $0x80] ss:$8 sps:$4 sm:$0xff]   ;;  %v3225_v14 = vld [vmem:[%s4087_s2 + $0x94] ss:$8 sps:$4 sm:$0xff]   ;;  %s3195_s17 = smul.u32 160, %s4135_s28  ;;  %s3515_s24 = sshll.u32 %s4135_s28, 7 }
  0x13   : > { %v3228_v16 = vld [vmem:[%s4087_s2 + $0x90] ss:$8 sps:$4 sm:$0xff]   ;;  %v3229_v17 = vld [vmem:[%s4087_s2 + $0x44] ss:$8 sps:$4 sm:$0xff]   ;;  %v3233_v19 = vld [vmem:[%s4087_s2 + $0x40] ss:$8 sps:$4 sm:$0xff]   ;;  %s3537_s15 = scalar_lea.vmem %s4086_s1, %s3515_s24  ;;  %s3855_s18 = scalar_lea.vmem %s4092_s7, %s3515_s24 }
  0x14   : > { %862 = vmatpush1.bf16.msra.mxu0 %v3215_v7  ;;  %593 = vmatpush1.bf16.msra.mxu1 %v3216_v8  ;;  %v3231_v18 = vld [vmem:[%s4087_s2 + $0xa4] ss:$8 sps:$4 sm:$0xff]   ;;  %v3234_v20 = vld [vmem:[%s4087_s2 + $0xa0] ss:$8 sps:$4 sm:$0xff]   ;;  %s3451_s10 = scalar_lea.vmem %s4085_s0, %s3195_s17  ;;  %v3235_v21 = vld [vmem:[%s4087_s2 + $0x54] ss:$8 sps:$4 sm:$0xff]   ;;  %s4064_s21 = scalar_lea.vmem %s4093_s8, %s3515_s24 }
  0x15   : > { %863 = vmatprep.subr.bf16.mxu0 %v3217_v9  ;;  %594 = vmatprep.subr.bf16.mxu1 %v3219_v10  ;;  %v3237_v22 = vld [vmem:[%s4087_s2 + $0xb4] ss:$8 sps:$4 sm:$0xff]   ;;  %v3239_v23 = vld [vmem:[%s4087_s2 + $0x50] ss:$8 sps:$4 sm:$0xff]   ;;  %v3244_v25 = vld [vmem:[%s4087_s2 + $0xc4] ss:$8 sps:$4 sm:$0xff]  }
  0x16   : > { %v3240_v24 = vld [vmem:[%s4087_s2 + $0xb0] ss:$8 sps:$4 sm:$0xff]   ;;  %v3241_v26 = vld [vmem:[%s3451_s10] sm:$0xff]   ;;  %v3251_v29 = vld [vmem:[%s4087_s2 + $0xd4] ss:$8 sps:$4 sm:$0xff]   ;;  %vm1686_vm1 = vcmask 523264  }
  0x17   : > { %v3245_v27 = vld [vmem:[%s3451_s10 + $0x10] sm:$0xff]   ;;  %v3242_v28 = vld [vmem:[%s4087_s2 + $0xc0] ss:$8 sps:$4 sm:$0xff]   ;;  %v3257_v31 = vld [vmem:[%s4087_s2 + $0xe4] ss:$8 sps:$4 sm:$0xff]  }
  0x18   : > { %864 = vmatpush1.bf16.msra.mxu0 %v3221_v11  ;;  %595 = vmatpush1.bf16.msra.mxu1 %v3222_v12  ;;  %v3249_v30 = vld [vmem:[%s4087_s2 + $0xd0] ss:$8 sps:$4 sm:$0xff]   ;;  %v3246_v32 = vld [vmem:[%s3451_s10 + $0x8] sm:$0xff]   ;;  %v3263_v34 = vld [vmem:[%s4088_s3] sm:$0xff]  }
  0x19   : > { %865 = vmatprep.subr.bf16.mxu0 %v3223_v13  ;;  %596 = vmatprep.subr.bf16.mxu1 %v3225_v14  ;;  %v3247_v33 = vld [vmem:[%s3451_s10 + $0x18] sm:$0xff]   ;;  %v3255_v35 = vld [vmem:[%s4087_s2 + $0xe0] ss:$8 sps:$4 sm:$0xff]   ;;  %v3269_v38 = vld [vmem:[%s4087_s2 + $0x104] ss:$8 sps:$4 sm:$0xff]  }
  0x1a   : > { %v3262_v36 = vld [vmem:[%s4087_s2 + $0xf4] ss:$8 sps:$4 sm:$0xff]   ;;  %v3260_v37 = vld [vmem:[%s4087_s2 + $0xf0] ss:$8 sps:$4 sm:$0xff]   ;;  %v3271_v39 = vld [vmem:[%s4088_s3 + $0x8] sm:$0xff]  }
  0x1b   : > { %v3248_v40 = vld [vmem:[%s3451_s10 + $0x20] sm:$0xff]   ;;  %v3276_v42 = vld [vmem:[%s4087_s2 + $0x114] ss:$8 sps:$4 sm:$0xff]   ;;  %v3274_v43 = vld [vmem:[%s4087_s2 + $0x110] ss:$8 sps:$4 sm:$0xff]  }
  0x1c   : > { %866 = vmatpush1.bf16.msra.mxu0 %v3227_v15  ;;  %597 = vmatpush1.bf16.msra.mxu1 %v3228_v16  ;;  %v3267_v41 = vld [vmem:[%s4087_s2 + $0x100] ss:$8 sps:$4 sm:$0xff]   ;;  %v3279_v44 = vld [vmem:[%s4088_s3 + $0x10] sm:$0xff]   ;;  %v3280_v45 = vld [vmem:[%s4088_s3 + $0x18] sm:$0xff]  }
  0x1d   : > { %867 = vmatprep.subr.bf16.mxu0 %v3229_v17  ;;  %598 = vmatprep.subr.bf16.mxu1 %v3231_v18  ;;  %v3252_v46 = vld [vmem:[%s3451_s10 + $0x28] sm:$0xff]   ;;  %v3253_v47 = vld [vmem:[%s3451_s10 + $0x30] sm:$0xff]   ;;  %v3254_v48 = vld [vmem:[%s3451_s10 + $0x38] sm:$0xff]  }
  0x1e   : > { %v3258_v49 = vld [vmem:[%s3451_s10 + $0x40] sm:$0xff]   ;;  %v3259_v50 = vld [vmem:[%s3451_s10 + $0x48] sm:$0xff]   ;;  %v3264_v51 = vld [vmem:[%s3451_s10 + $0x50] sm:$0xff]  }
  0x1f   : > { %v3265_v52 = vld [vmem:[%s3451_s10 + $0x58] sm:$0xff]   ;;  %v3266_v53 = vld [vmem:[%s3451_s10 + $0x60] sm:$0xff]   ;;  %v3270_v54 = vld [vmem:[%s3451_s10 + $0x68] sm:$0xff]  }
  0x20   : > { %868 = vmatpush1.bf16.msra.mxu0 %v3233_v19  ;;  %599 = vmatpush1.bf16.msra.mxu1 %v3234_v20  ;;  %v3272_v55 = vld [vmem:[%s3451_s10 + $0x70] sm:$0xff]   ;;  %v3273_v56 = vld [vmem:[%s3451_s10 + $0x78] sm:$0xff]   ;;  %v3277_v57 = vld [vmem:[%s3451_s10 + $0x80] sm:$0xff]  }
  0x21   : > { %869 = vmatprep.subr.bf16.mxu0 %v3235_v21  ;;  %600 = vmatprep.subr.bf16.mxu1 %v3237_v22  ;;  %v3278_v58 = vld [vmem:[%s3451_s10 + $0x88] sm:$0xff]   ;;  %v3282_v59 = vld [vmem:[%s3537_s15] sm:$0xff]   ;;  %v3286_v62 = vld [vmem:[%s3537_s15 + $0x10] sm:$0xff]  }
  0x22   : > { %v3281_v60 = vld [vmem:[%s3451_s10 + $0x20] sm:$0xff]   ;;  %v3283_v61 = vld [vmem:[%s3537_s15 + $0x8] sm:$0xff]   ;;  %v3287_v0 = vld [vmem:[%s3537_s15 + $0x18] sm:$0xff]  }
  0x23   : > { %v3284_v63 = vld [vmem:[%s3451_s10 + $0x28] sm:$0xff]   ;;  %v3290_v1 = vld [vmem:[%s3537_s15 + $0x20] sm:$0xff]   ;;  %v3285_v3 = vld [vmem:[%s3451_s10 + $0x30] sm:$0xff]  }
  0x24   : > { %870 = vmatpush1.bf16.msra.mxu0 %v3239_v23  ;;  %601 = vmatpush1.bf16.msra.mxu1 %v3240_v24  ;;  %v3291_v4 = vld [vmem:[%s3537_s15 + $0x28] sm:$0xff]   ;;  %v3294_v5 = vld [vmem:[%s3537_s15 + $0x30] sm:$0xff]   ;;  %v3288_v6 = vld [vmem:[%s3451_s10 + $0x38] sm:$0xff]  }
  0x25   : > { %1285 = vmatprep.subr.bf16.mxu0 %v3244_v25  ;;  %2979 = vmatprep.subr.bf16.mxu1 %v3263_v34  ;;  %v3295_v7 = vld [vmem:[%s3537_s15 + $0x38] sm:$0xff]   ;;  %v3298_v8 = vld [vmem:[%s3537_s15 + $0x40] sm:$0xff]   ;;  %v3299_v10 = vld [vmem:[%s3537_s15 + $0x48] sm:$0xff]  }
  0x26   : > { %v3289_v9 = vld [vmem:[%s3451_s10 + $0x40] sm:$0xff]   ;;  %v3302_v11 = vld [vmem:[%s3537_s15 + $0x50] sm:$0xff]   ;;  %v3292_v12 = vld [vmem:[%s3451_s10 + $0x48] sm:$0xff]  }
  0x27   : > { %2653 = vmatmul.mubr.msk.bf16.vlgmr.msra.gmra.mrb[0].mxu0 %vm541_vm0, %v3241_v26  ;;  %2623 = vmatmul.mubr.msk.bf16.vlgmr.msra.gmra.mrb[0].mxu1 %vm541_vm0, %v3245_v27  ;;  %v3303_v13 = vld [vmem:[%s3537_s15 + $0x58] sm:$0xff]   ;;  %v3306_v14 = vld [vmem:[%s3537_s15 + $0x60] sm:$0xff]   ;;  %v3293_v15 = vld [vmem:[%s3451_s10 + $0x50] sm:$0xff]  }
  0x28   : > { %1286 = vmatpush1.bf16.msra.mxu0 %v3242_v28  ;;  %901 = vmatprep.mubr.bf16.mxu0 %v3329_v2  ;;  %v3307_v16 = vld [vmem:[%s3537_s15 + $0x68] sm:$0xff]   ;;  %v3310_v17 = vld [vmem:[%s3537_s15 + $0x70] sm:$0xff]   ;;  %v3296_v18 = vld [vmem:[%s3451_s10 + $0x58] sm:$0xff]  }
  0x29   : > { %632 = vmatprep.mubr.bf16.mxu1 %v3329_v2  ;;  %1287 = vmatprep.subr.bf16.mxu0 %v3251_v29  ;;  %v3311_v19 = vld [vmem:[%s3537_s15 + $0x78] sm:$0xff]   ;;  %v3313_v20 = vld [vmem:[%s4091_s6] sm:$0xff]   ;;  %v3314_v22 = vld [vmem:[%s4091_s6 + $0x8] sm:$0xff]  }
  0x2a   : > { %2980 = vmatpush3.bf16.msra.mxu1 %v3263_v34  ;;  %v3297_v21 = vld [vmem:[%s3451_s10 + $0x60] sm:$0xff]   ;;  %v3300_v23 = vld [vmem:[%s3451_s10 + $0x68] sm:$0xff]   ;;  %v3315_v24 = vld [vmem:[%s4091_s6 + $0x10] sm:$0xff]  }
  0x2b   : > { %2981 = vmatprep.subr.bf16.mxu1 %v3271_v39  ;;  %v3301_v25 = vld [vmem:[%s3451_s10 + $0x70] sm:$0xff]   ;;  %v3316_v26 = vld [vmem:[%s4091_s6 + $0x18] sm:$0xff]  }
  0x2c   : > { %1288 = vmatpush1.bf16.msra.mxu0 %v3249_v30  ;;  %v3304_v28 = vld [vmem:[%s3451_s10 + $0x78] sm:$0xff]  }
  0x2d   : > { %1289 = vmatprep.subr.bf16.mxu0 %v3257_v31 }
  0x2e   : > { %2982 = vmatpush3.bf16.msra.mxu1 %v3271_v39  ;;  %v3319_v39 = vld [vmem:[%s4091_s6 + $0x30] sm:$0xff]  }
  0x2f   : > { %2654 = vmatmul.mubr.msk.bf16.gmra.mrb[4].mxu0 %vm541_vm0, %v3246_v32  ;;  %2624 = vmatmul.mubr.msk.bf16.gmra.mrb[4].mxu1 %vm541_vm0, %v3247_v33  ;;  %v3317_v32 = vld [vmem:[%s4091_s6 + $0x20] sm:$0xff]  }
  0x30   : > { %911 = vmatprep.mubr.bf16.mxu0 %v3329_v2  ;;  %642 = vmatprep.mubr.bf16.mxu1 %v3329_v2 }
  0x31   : > { %1290 = vmatpush1.bf16.msra.mxu0 %v3255_v35  ;;  %2983 = vmatprep.subr.bf16.mxu1 %v3279_v44  ;;  %v3305_v35 = vld [vmem:[%s3451_s10 + $0x80] sm:$0xff]  }
  0x32   : > { %1291 = vmatprep.subr.bf16.mxu0 %v3262_v36  ;;  %2984 = vmatpush3.bf16.msra.mxu1 %v3279_v44 }
  0x33   : > { %2985 = vmatprep.subr.bf16.mxu1 %v3280_v45 }
  0x35   : > { %1292 = vmatpush1.bf16.msra.mxu0 %v3260_v37 }
  0x36   : > { %1293 = vmatprep.subr.bf16.mxu0 %v3269_v38  ;;  %2986 = vmatpush3.bf16.msra.mxu1 %v3280_v45 }
  0x37   : > { %2655 = vmatmul.mubr.msk.bf16.gmra.mrb[8].mxu0 %vm541_vm0, %v3245_v27  ;;  %2625 = vmatmul.mubr.msk.bf16.gmra.mrb[8].mxu1 %vm541_vm0, %v3248_v40 }
  0x38   : > { %921 = vmatprep.mubr.bf16.mxu0 %v3329_v2  ;;  %652 = vmatprep.mubr.bf16.mxu1 %v3329_v2 }
  0x39   : > { %1294 = vmatpush1.bf16.msra.mxu0 %v3267_v41  ;;  %3019 = vmatprep.subr.bf16.mxu1 %v3313_v20 }
  0x3a   : > { %1295 = vmatprep.subr.bf16.mxu0 %v3276_v42  ;;  %v3308_v42 = vld [vmem:[%s3451_s10 + $0x88] sm:$0xff]  }
  0x3d   : > { %1296 = vmatpush1.bf16.msra.mxu0 %v3274_v43 }
  0x3f   : > { %2656 = vmatmul.mubr.msk.bf16.gmra.mrb[12].mxu0 %vm541_vm0, %v3247_v33  ;;  %2626 = vmatmul.mubr.msk.bf16.gmra.mrb[12].mxu1 %vm541_vm0, %v3252_v46  ;;  %v3318_v33 = vld [vmem:[%s4091_s6 + $0x28] sm:$0xff]  }
  0x40   : > { %931 = vmatprep.mubr.bf16.mxu0 %v3329_v2  ;;  %662 = vmatprep.mubr.bf16.mxu1 %v3329_v2 }
  0x47   : > { %2657 = vmatmul.mubr.msk.bf16.gmra.mrb[16].mxu0 %vm541_vm0, %v3248_v40  ;;  %2627 = vmatmul.mubr.msk.bf16.gmra.mrb[16].mxu1 %vm541_vm0, %v3253_v47  ;;  %v3320_v40 = vld [vmem:[%s4091_s6 + $0x38] sm:$0xff]  }
  0x48   : > { %941 = vmatprep.mubr.bf16.mxu0 %v3329_v2  ;;  %672 = vmatprep.mubr.bf16.mxu1 %v3329_v2 }
  0x4f   : > { %2658 = vmatmul.mubr.msk.bf16.gmra.mrb[20].mxu0 %vm541_vm0, %v3252_v46  ;;  %2628 = vmatmul.mubr.msk.bf16.gmra.mrb[20].mxu1 %vm541_vm0, %v3254_v48 }
  0x50   : > { %951 = vmatprep.mubr.bf16.mxu0 %v3329_v2  ;;  %682 = vmatprep.mubr.bf16.mxu1 %v3329_v2 }
  0x57   : > { %2659 = vmatmul.mubr.msk.bf16.gmra.mrb[24].mxu0 %vm541_vm0, %v3253_v47  ;;  %2629 = vmatmul.mubr.msk.bf16.gmra.mrb[24].mxu1 %vm541_vm0, %v3258_v49  ;;  %v3309_v47 = vld [vmem:[%s3451_s10 + $0x90] sm:$0xff]  }
  0x58   : > { %961 = vmatprep.mubr.bf16.mxu0 %v3329_v2  ;;  %692 = vmatprep.mubr.bf16.mxu1 %v3329_v2 }
  0x5f   : > { %2660 = vmatmul.mubr.msk.bf16.gmra.mrb[28].mxu0 %vm541_vm0, %v3254_v48  ;;  %2630 = vmatmul.mubr.msk.bf16.gmra.mrb[28].mxu1 %vm541_vm0, %v3259_v50 }
  0x60   : > { %971 = vmatprep.mubr.bf16.mxu0 %v3329_v2  ;;  %702 = vmatprep.mubr.bf16.mxu1 %v3329_v2 }
  0x67   : > { %2661 = vmatmul.mubr.msk.bf16.gmra.mrb[32].mxu0 %vm541_vm0, %v3258_v49  ;;  %2631 = vmatmul.mubr.msk.bf16.gmra.mrb[32].mxu1 %vm541_vm0, %v3264_v51 }
  0x68   : > { %981 = vmatprep.mubr.bf16.mxu0 %v3329_v2  ;;  %712 = vmatprep.mubr.bf16.mxu1 %v3329_v2 }
  0x6f   : > { %2662 = vmatmul.mubr.msk.bf16.gmra.mrb[36].mxu0 %vm541_vm0, %v3259_v50  ;;  %2632 = vmatmul.mubr.msk.bf16.gmra.mrb[36].mxu1 %vm541_vm0, %v3265_v52 }
  0x70   : > { %991 = vmatprep.mubr.bf16.mxu0 %v3329_v2  ;;  %722 = vmatprep.mubr.bf16.mxu1 %v3329_v2 }
  0x77   : > { %2663 = vmatmul.mubr.msk.bf16.gmra.mrb[40].mxu0 %vm541_vm0, %v3264_v51  ;;  %2633 = vmatmul.mubr.msk.bf16.gmra.mrb[40].mxu1 %vm541_vm0, %v3266_v53 }
  0x78   : > { %1001 = vmatprep.mubr.bf16.mxu0 %v3329_v2  ;;  %732 = vmatprep.mubr.bf16.mxu1 %v3329_v2 }
  0x7f   : > { %2664 = vmatmul.mubr.msk.bf16.gmra.mrb[44].mxu0 %vm541_vm0, %v3265_v52  ;;  %2634 = vmatmul.mubr.msk.bf16.gmra.mrb[44].mxu1 %vm541_vm0, %v3270_v54  ;;  %v3312_v52 = vld [vmem:[%s3451_s10 + $0x98] sm:$0xff]  }
  0x80   : > { %1011 = vmatprep.mubr.bf16.mxu0 %v3329_v2  ;;  %742 = vmatprep.mubr.bf16.mxu1 %v3329_v2 }
  0x87   : > { %2665 = vmatmul.mubr.msk.bf16.gmra.mrb[48].mxu0 %vm541_vm0, %v3266_v53  ;;  %2635 = vmatmul.mubr.msk.bf16.gmra.mrb[48].mxu1 %vm541_vm0, %v3272_v55 }
  0x88   : > { %1021 = vmatprep.mubr.bf16.mxu0 %v3329_v2  ;;  %752 = vmatprep.mubr.bf16.mxu1 %v3329_v2 }
  0x8f   : > { %2666 = vmatmul.mubr.msk.bf16.gmra.mrb[52].mxu0 %vm541_vm0, %v3270_v54  ;;  %2636 = vmatmul.mubr.msk.bf16.gmra.mrb[52].mxu1 %vm541_vm0, %v3273_v56 }
  0x90   : > { %1031 = vmatprep.mubr.bf16.mxu0 %v3329_v2  ;;  %762 = vmatprep.mubr.bf16.mxu1 %v3329_v2 }
  0x97   : > { %2667 = vmatmul.mubr.msk.bf16.gmra.mrb[56].mxu0 %vm541_vm0, %v3272_v55  ;;  %2637 = vmatmul.mubr.msk.bf16.gmra.mrb[56].mxu1 %vm541_vm0, %v3277_v57 }
  0x98   : > { %1041 = vmatprep.mubr.bf16.mxu0 %v3329_v2  ;;  %772 = vmatprep.mubr.bf16.mxu1 %v3329_v2 }
  0x9f   : > { %2668 = vmatmul.mubr.msk.bf16.gmra.mrb[60].mxu0 %vm541_vm0, %v3273_v56  ;;  %2638 = vmatmul.mubr.msk.bf16.gmra.mrb[60].mxu1 %vm541_vm0, %v3278_v58 }
  0xa0   : > { %1317 = vmatprep.mubr.bf16.mxu0 %v3329_v2  ;;  %2987 = vmatprep.mubr.msk.bf16.mxu1 %vm1686_vm1, %v3282_v59 }
  0xa7   : > { %2709 = vmatmul.mubr.msk.bf16.vlgmr.msra.gmra.mrb[0].mxu0 %vm541_vm0, %v3281_v60  ;;  %2988 = vmatmul.mubr.msk.bf16.vlgmr.msra.gmra.mrb[64].mxu1 %vm1686_vm1, %v3283_v61 }
  0xa8   : > { %1327 = vmatprep.mubr.bf16.mxu0 %v3329_v2  ;;  %2991 = vmatprep.mubr.msk.bf16.mxu1 %vm1686_vm1, %v3286_v62 }
  0xa9   : > { %3020 = vmatpush3.bf16.msra.mxu1 %v3313_v20 }
  0xaa   : > { %3021 = vmatprep.subr.bf16.mxu1 %v3314_v22 }
  0xad   : > { %3022 = vmatpush3.bf16.msra.mxu1 %v3314_v22 }
  0xae   : > { %3023 = vmatprep.subr.bf16.mxu1 %v3315_v24 }
  0xaf   : > { %2710 = vmatmul.mubr.msk.bf16.gmra.mrb[4].mxu0 %vm541_vm0, %v3284_v63  ;;  %2992 = vmatmul.mubr.msk.bf16.gmra.mrb[68].mxu1 %vm1686_vm1, %v3287_v0 }
  0xb0   : > { %1337 = vmatprep.mubr.bf16.mxu0 %v3329_v2  ;;  %2995 = vmatprep.mubr.msk.bf16.mxu1 %vm1686_vm1, %v3290_v1 }
  0xb1   : > { %3024 = vmatpush3.bf16.msra.mxu1 %v3315_v24 }
  0xb2   : > { %3025 = vmatprep.subr.bf16.mxu1 %v3316_v26 }
  0xb5   : > { %3026 = vmatpush3.bf16.msra.mxu1 %v3316_v26 }
  0xb6   : > { %3027 = vmatprep.subr.bf16.mxu1 %v3317_v32 }
  0xb7   : > { %2711 = vmatmul.mubr.msk.bf16.gmra.mrb[8].mxu0 %vm541_vm0, %v3285_v3  ;;  %2996 = vmatmul.mubr.msk.bf16.gmra.mrb[72].mxu1 %vm1686_vm1, %v3291_v4 }
  0xb8   : > { %1347 = vmatprep.mubr.bf16.mxu0 %v3329_v2  ;;  %2999 = vmatprep.mubr.msk.bf16.mxu1 %vm1686_vm1, %v3294_v5 }
  0xb9   : > { %3028 = vmatpush3.bf16.msra.mxu1 %v3317_v32 }
  0xba   : > { %3029 = vmatprep.subr.bf16.mxu1 %v3318_v33 }
  0xbd   : > { %3030 = vmatpush3.bf16.msra.mxu1 %v3318_v33 }
  0xbe   : > { %3031 = vmatprep.subr.bf16.mxu1 %v3319_v39 }
  0xbf   : > { %2712 = vmatmul.mubr.msk.bf16.gmra.mrb[12].mxu0 %vm541_vm0, %v3288_v6  ;;  %3000 = vmatmul.mubr.msk.bf16.gmra.mrb[76].mxu1 %vm1686_vm1, %v3295_v7 }
  0xc0   : > { %1357 = vmatprep.mubr.bf16.mxu0 %v3329_v2  ;;  %3003 = vmatprep.mubr.msk.bf16.mxu1 %vm1686_vm1, %v3298_v8 }
  0xc1   : > { %3032 = vmatpush3.bf16.msra.mxu1 %v3319_v39 }
  0xc2   : > { %3033 = vmatprep.subr.bf16.mxu1 %v3320_v40 }
  0xc5   : > { %3034 = vmatpush3.bf16.msra.mxu1 %v3320_v40 }
  0xc7   : > { %2713 = vmatmul.mubr.msk.bf16.gmra.mrb[16].mxu0 %vm541_vm0, %v3289_v9  ;;  %3004 = vmatmul.mubr.msk.bf16.gmra.mrb[80].mxu1 %vm1686_vm1, %v3299_v10 }
  0xc8   : > { %1367 = vmatprep.mubr.bf16.mxu0 %v3329_v2  ;;  %3007 = vmatprep.mubr.msk.bf16.mxu1 %vm1686_vm1, %v3302_v11 }
  0xcf   : > { %2714 = vmatmul.mubr.msk.bf16.gmra.mrb[20].mxu0 %vm541_vm0, %v3292_v12  ;;  %3008 = vmatmul.mubr.msk.bf16.gmra.mrb[84].mxu1 %vm1686_vm1, %v3303_v13 }
  0xd0   : > { %1377 = vmatprep.mubr.bf16.mxu0 %v3329_v2  ;;  %3011 = vmatprep.mubr.msk.bf16.mxu1 %vm1686_vm1, %v3306_v14 }
  0xd7   : > { %2715 = vmatmul.mubr.msk.bf16.gmra.mrb[24].mxu0 %vm541_vm0, %v3293_v15  ;;  %3012 = vmatmul.mubr.msk.bf16.gmra.mrb[88].mxu1 %vm1686_vm1, %v3307_v16 }
  0xd8   : > { %1387 = vmatprep.mubr.bf16.mxu0 %v3329_v2  ;;  %3015 = vmatprep.mubr.msk.bf16.mxu1 %vm1686_vm1, %v3310_v17 }
  0xdf   : > { %2716 = vmatmul.mubr.msk.bf16.gmra.mrb[28].mxu0 %vm541_vm0, %v3296_v18  ;;  %3016 = vmatmul.mubr.msk.bf16.gmra.mrb[92].mxu1 %vm1686_vm1, %v3311_v19 }
  0xe0   : > { %1397 = vmatprep.mubr.bf16.mxu0 %v3329_v2 }
  0xe7   : > { %2717 = vmatmul.mubr.msk.bf16.gmra.mrb[32].mxu0 %vm541_vm0, %v3297_v21 }
  0xe8   : > { %1407 = vmatprep.mubr.bf16.mxu0 %v3329_v2 }
  0xef   : > { %2718 = vmatmul.mubr.msk.bf16.gmra.mrb[36].mxu0 %vm541_vm0, %v3300_v23 }
  0xf0   : > { %1417 = vmatprep.mubr.bf16.mxu0 %v3329_v2 }
  0xf7   : > { %2719 = vmatmul.mubr.msk.bf16.gmra.mrb[40].mxu0 %vm541_vm0, %v3301_v25 }
  0xf8   : > { %1427 = vmatprep.mubr.bf16.mxu0 %v3329_v2 }
  0xfa   : > { %v3680_v27 = vpop.f32.mrb[0].mxu1 }
  0xfb   : > { %v3683_v29 = vpop.f32.mrb[1].mxu1 }
  0xfc   : > { %v3685_v30 = vpop.f32.mrb[2].mxu1 }
  0xfd   : > { %v3687_v31 = vpop.f32.mrb[3].mxu1 }
  0xff   : > { %2720 = vmatmul.mubr.msk.bf16.gmra.mrb[44].mxu0 %vm541_vm0, %v3304_v28 }
 0x100   : > { %1437 = vmatprep.mubr.bf16.mxu0 %v3329_v2 }
 0x102   : > { %v3697_v34 = vpop.f32.mrb[4].mxu1 }
 0x103   : > { %v3700_v36 = vpop.f32.mrb[5].mxu1 }
 0x104   : > { %v3702_v37 = vpop.f32.mrb[6].mxu1 }
 0x105   : > { %v3704_v38 = vpop.f32.mrb[7].mxu1 }
 0x107   : > { %2721 = vmatmul.mubr.msk.bf16.gmra.mrb[48].mxu0 %vm541_vm0, %v3305_v35 }
 0x108   : > { %1447 = vmatprep.mubr.bf16.mxu0 %v3329_v2 }
 0x10a   : > { %v3714_v41 = vpop.f32.mrb[8].mxu1 }
 0x10b   : > { %v3717_v43 = vpop.f32.mrb[9].mxu1 }
 0x10c   : > { %v3719_v44 = vpop.f32.mrb[10].mxu1 }
 0x10d   : > { %v3721_v45 = vpop.f32.mrb[11].mxu1 }
 0x10f   : > { %2722 = vmatmul.mubr.msk.bf16.gmra.mrb[52].mxu0 %vm541_vm0, %v3308_v42 }
 0x110   : > { %1457 = vmatprep.mubr.bf16.mxu0 %v3329_v2 }
 0x112   : > { %v3725_v46 = vpop.f32.mrb[12].mxu1 }
 0x113   : > { %v3728_v48 = vpop.f32.mrb[13].mxu1 }
 0x114   : > { %v3730_v49 = vpop.f32.mrb[14].mxu1 }
 0x115   : > { %v3732_v50 = vpop.f32.mrb[15].mxu1 }
 0x117   : > { %2723 = vmatmul.mubr.msk.bf16.gmra.mrb[56].mxu0 %vm541_vm0, %v3309_v47 }
 0x118   : > { %1467 = vmatprep.mubr.bf16.mxu0 %v3329_v2 }
 0x11a   : > { %v3736_v51 = vpop.f32.mrb[16].mxu1 }
 0x11b   : > { %v3739_v53 = vpop.f32.mrb[17].mxu1 }
 0x11c   : > { %v3741_v54 = vpop.f32.mrb[18].mxu1 }
 0x11d   : > { %v3743_v55 = vpop.f32.mrb[19].mxu1 }
 0x11f   : > { %2724 = vmatmul.mubr.msk.bf16.gmra.mrb[60].mxu0 %vm541_vm0, %v3312_v52 }
 0x122   : > { %v3746_v56 = vpop.f32.mrb[20].mxu1 }
 0x123   : > { %v3748_v57 = vpop.f32.mrb[21].mxu1 }
 0x124   : > { %v3750_v58 = vpop.f32.mrb[22].mxu1 }
 0x125   : > { %v3752_v59 = vpop.f32.mrb[23].mxu1 }
 0x12a   : > { %v3754_v2 = vpop.f32.mrb[24].mxu1 }
 0x12b   : > { %v3756_v60 = vpop.f32.mrb[25].mxu1 }
 0x12c   : > { %v3758_v61 = vpop.f32.mrb[26].mxu1 }
 0x12d   : > { %v3760_v62 = vpop.f32.mrb[27].mxu1 }
 0x132   : > { %v3762_v63 = vpop.f32.mrb[28].mxu1 }
 0x133   : > { %v3764_v0 = vpop.f32.mrb[29].mxu1 }
 0x134   : > { %v3766_v1 = vpop.f32.mrb[30].mxu1 }
 0x135   : > { %v3768_v3 = vpop.f32.mrb[31].mxu1 }
 0x13a   : > { %v3770_v4 = vpop.f32.mrb[32].mxu1 }
 0x13b   : > { %v3772_v5 = vpop.f32.mrb[33].mxu1 }
 0x13c   : > { %v3774_v6 = vpop.f32.mrb[34].mxu1 }
 0x13d   : > { %v3776_v7 = vpop.f32.mrb[35].mxu1 }
 0x142   : > { %v3778_v8 = vpop.f32.mrb[36].mxu1 }
 0x143   : > { %v3780_v9 = vpop.f32.mrb[37].mxu1 }
 0x144   : > { %v3782_v10 = vpop.f32.mrb[38].mxu1 }
 0x145   : > { %v3784_v11 = vpop.f32.mrb[39].mxu1 }
 0x14a   : > { %v3786_v12 = vpop.f32.mrb[40].mxu1 }
 0x14b   : > { %v3788_v13 = vpop.f32.mrb[41].mxu1 }
 0x14c   : > { %v3790_v14 = vpop.f32.mrb[42].mxu1 }
 0x14d   : > { %v3792_v15 = vpop.f32.mrb[43].mxu1 }
 0x152   : > { %v3794_v16 = vpop.f32.mrb[44].mxu1 }
 0x153   : > { %4094 = vst [vmem:[#allocation2_spill] sm:$0xff] %v3794_v16  ;;  %v3796_v17 = vpop.f32.mrb[45].mxu1 }
 0x154   : > { %4095 = vst [vmem:[#allocation3_spill] sm:$0xff] %v3796_v17  ;;  %v3798_v18 = vpop.f32.mrb[46].mxu1 }
 0x155   : > { %4096 = vst [vmem:[#allocation4_spill] sm:$0xff] %v3798_v18  ;;  %v3800_v19 = vpop.f32.mrb[47].mxu1 }
 0x156   : > { %4097 = vst [vmem:[#allocation5_spill] sm:$0xff] %v3800_v19 }
 0x15a   : > { %v3802_v20 = vpop.f32.mrb[48].mxu1 }
 0x15b   : > { %4098 = vst [vmem:[#allocation6_spill] sm:$0xff] %v3802_v20  ;;  %v3804_v21 = vpop.f32.mrb[49].mxu1 }
 0x15c   : > { %4099 = vst [vmem:[#allocation7_spill] sm:$0xff] %v3804_v21  ;;  %v3806_v22 = vpop.f32.mrb[50].mxu1 }
 0x15d   : > { %4100 = vst [vmem:[#allocation8_spill] sm:$0xff] %v3806_v22  ;;  %v3808_v23 = vpop.f32.mrb[51].mxu1 }
 0x15e   : > { %4101 = vst [vmem:[#allocation9_spill] sm:$0xff] %v3808_v23 }
 0x162   : > { %v3810_v24 = vpop.f32.mrb[52].mxu1 }
 0x163   : > { %4102 = vst [vmem:[#allocation10_spill] sm:$0xff] %v3810_v24  ;;  %v3812_v25 = vpop.f32.mrb[53].mxu1 }
 0x164   : > { %4103 = vst [vmem:[#allocation11_spill] sm:$0xff] %v3812_v25  ;;  %v3814_v26 = vpop.f32.mrb[54].mxu1 }
 0x165   : > { %4104 = vst [vmem:[#allocation12_spill] sm:$0xff] %v3814_v26  ;;  %v3816_v28 = vpop.f32.mrb[55].mxu1 }
 0x166   : > { %4105 = vst [vmem:[#allocation13_spill] sm:$0xff] %v3816_v28 }
 0x16a   : > { %v3818_v32 = vpop.f32.mrb[56].mxu1 }
 0x16b   : > { %4106 = vst [vmem:[#allocation14_spill] sm:$0xff] %v3818_v32  ;;  %v3820_v33 = vpop.f32.mrb[57].mxu1 }
 0x16c   : > { %4107 = vst [vmem:[#allocation15_spill] sm:$0xff] %v3820_v33  ;;  %v3822_v35 = vpop.f32.mrb[58].mxu1 }
 0x16d   : > { %4108 = vst [vmem:[#allocation16_spill] sm:$0xff] %v3822_v35  ;;  %v3824_v39 = vpop.f32.mrb[59].mxu1 }
 0x16e   : > { %4109 = vst [vmem:[#allocation17_spill] sm:$0xff] %v3824_v39 }
 0x172   : > { %v3826_v40 = vpop.f32.mrb[60].mxu1 }
 0x173   : > { %4110 = vst [vmem:[#allocation18_spill] sm:$0xff] %v3826_v40  ;;  %v3828_v42 = vpop.f32.mrb[61].mxu1  ;;  %v3839_v40 = vld [vmem:[%s4089_s4] ss:$0 sm:$0xff] }
 0x174   : > { %4111 = vst [vmem:[#allocation19_spill] sm:$0xff] %v3828_v42  ;;  %v3830_v47 = vpop.f32.mrb[62].mxu1 }
 0x175   : > { %4112 = vst [vmem:[#allocation20_spill] sm:$0xff] %v3830_v47  ;;  %v3832_v52 = vpop.f32.mrb[63].mxu1 }
 0x176   : > { %4113 = vst [vmem:[#allocation21_spill] sm:$0xff] %v3832_v52  ;;  %v3844_v52 = vld [vmem:[%s4090_s5] ss:$0 sm:$0xff] }
 0x17a   : > { %v1319_v25 = vpop.f32.mrb[0].mxu0  ;;  %v2989_v26 = vpop.f32.mrb[64].mxu1 }
 0x17b   : > { %v3067_v28 = vadd.f32 %v1319_v25, %v3680_v27  ;;  %v1321_v24 = vpop.f32.mrb[1].mxu0  ;;  %v1769_v32 = vpop.f32.mrb[65].mxu1 }
 0x17c   : > { %v3068_v33 = vadd.f32 %v1321_v24, %v3683_v29  ;;  %v1323_v35 = vpop.f32.mrb[2].mxu0  ;;  %v2990_v42 = vpop.f32.mrb[66].mxu1 }
 0x17d   : > { %v3069_v47 = vadd.f32 %v1323_v35, %v3685_v30  ;;  %v1896_v27 = vadd.f32 %v3067_v28, %v1769_v32  ;;  %v1325_v25 = vpop.f32.mrb[3].mxu0  ;;  %v1772_v39 = vpop.f32.mrb[67].mxu1 }
 0x17e   : > { %v3070_v23 = vadd.f32 %v1325_v25, %v3687_v31  ;;  %v2006_v22 = vadd.f32 %v3068_v33, %v3844_v52 }
 0x17f   : > { %v1935_v29 = vadd.f32 %v3839_v40, %v1896_v27  ;;  %v1897_v24 = vadd.f32 %v3069_v47, %v1772_v39 }
 0x180   : > { %v2007_v21 = vadd.f32 %v3070_v23, %v3844_v52 }
 0x181   : > { %v1936_v30 = vadd.f32 %v3839_v40, %v1897_v24  ;;  %v1967_v20 = vmax.f32 %v1935_v29, 0.0 }
 0x182   : > { %v2843_v28 = vpack.c.bf16 %v2007_v21, %v2006_v22  ;;  %v1329_v32 = vpop.f32.mrb[4].mxu0  ;;  %v2993_v35 = vpop.f32.mrb[68].mxu1 }
 0x183   : > { %v1968_v31 = vmax.f32 %v1936_v30, 0.0  ;;  %v3071_v27 = vadd.f32 %v1329_v32, %v3697_v34  ;;  %v1331_v39 = vpop.f32.mrb[5].mxu0  ;;  %v1785_v47 = vpop.f32.mrb[69].mxu1 }
 0x184   : > { %2844 = vst [vmem:[%s3855_s18] sm:$0xff] %v2843_v28   ;;  %v3072_v23 = vadd.f32 %v1331_v39, %v3700_v36  ;;  %v1333_v33 = vpop.f32.mrb[6].mxu0  ;;  %v2994_v25 = vpop.f32.mrb[70].mxu1 }
 0x185   : > { %v1898_v19 = vadd.f32 %v3071_v27, %v2989_v26  ;;  %v3073_v18 = vadd.f32 %v1333_v33, %v3702_v37  ;;  %v1335_v17 = vpop.f32.mrb[7].mxu0  ;;  %v2198_v16 = vpack.c.bf16 %v1968_v31, %v1967_v20  ;;  %v1788_v24 = vpop.f32.mrb[71].mxu1 }
 0x186   : > { %v3074_v21 = vadd.f32 %v1335_v17, %v3704_v38  ;;  %v2008_v34 = vadd.f32 %v3072_v23, %v3844_v52 }
 0x187   : > { %v1937_v22 = vadd.f32 %v3839_v40, %v1898_v19  ;;  %v1899_v29 = vadd.f32 %v3073_v18, %v2990_v42  ;;  %3035 = vmatprep.mubr.bf16.mxu1 %v2198_v16 }
 0x188   : > { %v2009_v30 = vadd.f32 %v3074_v21, %v3844_v52 }
 0x189   : > { %v1938_v36 = vadd.f32 %v3839_v40, %v1899_v29  ;;  %v1969_v37 = vmax.f32 %v1937_v22, 0.0 }
 0x18a   : > { %v2848_v28 = vpack.c.bf16 %v2009_v30, %v2008_v34  ;;  %v1339_v26 = vpop.f32.mrb[8].mxu0  ;;  %v3867_v32 = vpop.f32.mrb[72].mxu1 }
 0x18b   : > { %v1970_v20 = vmax.f32 %v1938_v36, 0.0  ;;  %v3075_v31 = vadd.f32 %v1339_v26, %v3714_v41  ;;  %v1341_v27 = vpop.f32.mrb[9].mxu0  ;;  %v1801_v38 = vpop.f32.mrb[73].mxu1 }
 0x18c   : > { %2920 = vst [vmem:[%s3855_s18 + $0x8] sm:$0xff] %v2848_v28   ;;  %v3076_v17 = vadd.f32 %v1341_v27, %v3717_v43  ;;  %v1343_v16 = vpop.f32.mrb[10].mxu0  ;;  %v3872_v18 = vpop.f32.mrb[74].mxu1 }
 0x18d   : > { %v2199_v19 = vpack.c.bf16 %v1970_v20, %v1969_v37  ;;  %v3077_v42 = vadd.f32 %v1343_v16, %v3719_v44  ;;  %v1900_v39 = vadd.f32 %v3075_v31, %v1785_v47  ;;  %v1345_v23 = vpop.f32.mrb[11].mxu0  ;;  %v1804_v33 = vpop.f32.mrb[75].mxu1 }
 0x18e   : > { %v3078_v21 = vadd.f32 %v1345_v23, %v3721_v45  ;;  %v2010_v29 = vadd.f32 %v3076_v17, %v3844_v52 }
 0x18f   : > { %v1939_v22 = vadd.f32 %v3839_v40, %v1900_v39  ;;  %v1901_v41 = vadd.f32 %v3077_v42, %v1788_v24  ;;  %3036 = vmatmul.mubr.bf16.vlgmr.msra.gmra.mrb[96].mxu1 %v2199_v19 }
 0x190   : > { %v2011_v43 = vadd.f32 %v3078_v21, %v3844_v52 }
 0x191   : > { %v1940_v34 = vadd.f32 %v3839_v40, %v1901_v41  ;;  %v1971_v44 = vmax.f32 %v1939_v22, 0.0 }
 0x192   : > { %v2853_v30 = vpack.c.bf16 %v2011_v43, %v2010_v29  ;;  %v1349_v36 = vpop.f32.mrb[12].mxu0  ;;  %v3880_v28 = vpop.f32.mrb[76].mxu1 }
 0x193   : > { %v1972_v47 = vmax.f32 %v1940_v34, 0.0  ;;  %v3079_v26 = vadd.f32 %v1349_v36, %v3725_v46  ;;  %v1351_v37 = vpop.f32.mrb[13].mxu0  ;;  %v3883_v45 = vpop.f32.mrb[77].mxu1 }
 0x194   : > { %2921 = vst [vmem:[%s3855_s18 + $0x10] sm:$0xff] %v2853_v30   ;;  %v3080_v24 = vadd.f32 %v1351_v37, %v3728_v48  ;;  %v1353_v20 = vpop.f32.mrb[14].mxu0  ;;  %v3887_v31 = vpop.f32.mrb[78].mxu1 }
 0x195   : > { %v1902_v27 = vadd.f32 %v3079_v26, %v2993_v35  ;;  %v3081_v17 = vadd.f32 %v1353_v20, %v3730_v49  ;;  %v1355_v16 = vpop.f32.mrb[15].mxu0  ;;  %v2200_v19 = vpack.c.bf16 %v1972_v47, %v1971_v44  ;;  %v3890_v42 = vpop.f32.mrb[79].mxu1 }
 0x196   : > { %v3082_v39 = vadd.f32 %v1355_v16, %v3732_v50  ;;  %v2012_v21 = vadd.f32 %v3080_v24, %v3844_v52 }
 0x197   : > { %v1941_v46 = vadd.f32 %v3839_v40, %v1902_v27  ;;  %v1903_v23 = vadd.f32 %v3081_v17, %v2994_v25  ;;  %3039 = vmatprep.mubr.bf16.mxu1 %v2200_v19 }
 0x198   : > { %v2013_v48 = vadd.f32 %v3082_v39, %v3844_v52 }
 0x199   : > { %v1942_v22 = vadd.f32 %v3839_v40, %v1903_v23  ;;  %v1973_v29 = vmax.f32 %v1941_v46, 0.0 }
 0x19a   : > { %v2858_v35 = vpack.c.bf16 %v2013_v48, %v2012_v21  ;;  %v1359_v41 = vpop.f32.mrb[16].mxu0  ;;  %v3897_v49 = vpop.f32.mrb[80].mxu1 }
 0x19b   : > { %v1974_v43 = vmax.f32 %v1942_v22, 0.0  ;;  %v3083_v34 = vadd.f32 %v1359_v41, %v3736_v51  ;;  %v1361_v30 = vpop.f32.mrb[17].mxu0  ;;  %v3900_v50 = vpop.f32.mrb[81].mxu1 }
 0x19c   : > { %2922 = vst [vmem:[%s3855_s18 + $0x18] sm:$0xff] %v2858_v35   ;;  %v3084_v25 = vadd.f32 %v1361_v30, %v3739_v53  ;;  %v1363_v36 = vpop.f32.mrb[18].mxu0  ;;  %v3904_v44 = vpop.f32.mrb[82].mxu1 }
 0x19d   : > { %v3085_v47 = vadd.f32 %v1363_v36, %v3741_v54  ;;  %v1904_v26 = vadd.f32 %v3083_v34, %v1801_v38  ;;  %v1365_v37 = vpop.f32.mrb[19].mxu0  ;;  %v2201_v24 = vpack.c.bf16 %v1974_v43, %v1973_v29  ;;  %v3907_v20 = vpop.f32.mrb[83].mxu1 }
 0x19e   : > { %v3086_v27 = vadd.f32 %v1365_v37, %v3743_v55  ;;  %v2014_v16 = vadd.f32 %v3084_v25, %v3844_v52 }
 0x19f   : > { %v1943_v51 = vadd.f32 %v3839_v40, %v1904_v26  ;;  %v1905_v17 = vadd.f32 %v3085_v47, %v1804_v33  ;;  %3040 = vmatmul.mubr.bf16.gmra.mrb[100].mxu1 %v2201_v24 }
 0x1a0   : > { %v2015_v53 = vadd.f32 %v3086_v27, %v3844_v52 }
 0x1a1   : > { %v1944_v19 = vadd.f32 %v3839_v40, %v1905_v17  ;;  %v1975_v46 = vmax.f32 %v1943_v51, 0.0 }
 0x1a2   : > { %v2863_v39 = vpack.c.bf16 %v2015_v53, %v2014_v16  ;;  %v1369_v54 = vpop.f32.mrb[20].mxu0  ;;  %v3914_v38 = vpop.f32.mrb[84].mxu1 }
 0x1a3   : > { %v1976_v23 = vmax.f32 %v1944_v19, 0.0  ;;  %v3087_v21 = vadd.f32 %v1369_v54, %v3746_v56  ;;  %v1371_v48 = vpop.f32.mrb[21].mxu0  ;;  %v3917_v55 = vpop.f32.mrb[85].mxu1 }
 0x1a4   : > { %2923 = vst [vmem:[%s3855_s18 + $0x20] sm:$0xff] %v2863_v39   ;;  %v3088_v33 = vadd.f32 %v1371_v48, %v3748_v57  ;;  %v1373_v22 = vpop.f32.mrb[22].mxu0  ;;  %v3921_v35 = vpop.f32.mrb[86].mxu1 }
 0x1a5   : > { %v1906_v41 = vadd.f32 %v3087_v21, %v3867_v32  ;;  %v3089_v29 = vadd.f32 %v1373_v22, %v3750_v58  ;;  %v1375_v43 = vpop.f32.mrb[23].mxu0  ;;  %v2202_v34 = vpack.c.bf16 %v1976_v23, %v1975_v46  ;;  %v3925_v30 = vpop.f32.mrb[87].mxu1 }
 0x1a6   : > { %v3090_v56 = vadd.f32 %v1375_v43, %v3752_v59  ;;  %v2016_v57 = vadd.f32 %v3088_v33, %v3844_v52 }
 0x1a7   : > { %v1945_v25 = vadd.f32 %v3839_v40, %v1906_v41  ;;  %v1907_v36 = vadd.f32 %v3089_v29, %v3872_v18  ;;  %3043 = vmatprep.mubr.bf16.mxu1 %v2202_v34 }
 0x1a8   : > { %v2017_v47 = vadd.f32 %v3090_v56, %v3844_v52 }
 0x1a9   : > { %v1946_v32 = vadd.f32 %v3839_v40, %v1907_v36  ;;  %v1977_v24 = vmax.f32 %v1945_v25, 0.0 }
 0x1aa   : > { %v2868_v26 = vpack.c.bf16 %v2017_v47, %v2016_v57  ;;  %v1379_v58 = vpop.f32.mrb[24].mxu0  ;;  %v3933_v37 = vpop.f32.mrb[88].mxu1 }
 0x1ab   : > { %v1978_v27 = vmax.f32 %v1946_v32, 0.0  ;;  %v3091_v51 = vadd.f32 %v1379_v58, %v3754_v2  ;;  %v1381_v59 = vpop.f32.mrb[25].mxu0  ;;  %v3936_v17 = vpop.f32.mrb[89].mxu1 }
 0x1ac   : > { %2924 = vst [vmem:[%s3855_s18 + $0x28] sm:$0xff] %v2868_v26   ;;  %v3092_v18 = vadd.f32 %v1381_v59, %v3756_v60  ;;  %v1383_v16 = vpop.f32.mrb[26].mxu0  ;;  %v3940_v53 = vpop.f32.mrb[90].mxu1 }
 0x1ad   : > { %v3093_v19 = vadd.f32 %v1383_v16, %v3758_v61  ;;  %v1908_v39 = vadd.f32 %v3091_v51, %v3883_v45  ;;  %v1385_v54 = vpop.f32.mrb[27].mxu0  ;;  %v2203_v46 = vpack.c.bf16 %v1978_v27, %v1977_v24  ;;  %v3944_v23 = vpop.f32.mrb[91].mxu1 }
 0x1ae   : > { %v3094_v2 = vadd.f32 %v1385_v54, %v3760_v62  ;;  %v2018_v60 = vadd.f32 %v3092_v18, %v3844_v52 }
 0x1af   : > { %v1947_v21 = vadd.f32 %v3839_v40, %v1908_v39  ;;  %v1909_v48 = vadd.f32 %v3093_v19, %v3890_v42  ;;  %3044 = vmatmul.mubr.bf16.gmra.mrb[104].mxu1 %v2203_v46 }
 0x1b0   : > { %v2019_v33 = vadd.f32 %v3094_v2, %v3844_v52 }
 0x1b1   : > { %v1948_v61 = vadd.f32 %v3839_v40, %v1909_v48  ;;  %v1979_v29 = vmax.f32 %v1947_v21, 0.0 }
 0x1b2   : > { %v2873_v22 = vpack.c.bf16 %v2019_v33, %v2018_v60  ;;  %v1389_v45 = vpop.f32.mrb[28].mxu0  ;;  %v3952_v41 = vpop.f32.mrb[92].mxu1 }
 0x1b3   : > { %v1980_v43 = vmax.f32 %v1948_v61, 0.0  ;;  %v3095_v34 = vadd.f32 %v1389_v45, %v3762_v63  ;;  %v1391_v62 = vpop.f32.mrb[29].mxu0  ;;  %v3955_v56 = vpop.f32.mrb[93].mxu1 }
 0x1b4   : > { %2925 = vst [vmem:[%s3855_s18 + $0x30] sm:$0xff] %v2873_v22   ;;  %v3096_v42 = vadd.f32 %v1391_v62, %v3764_v0  ;;  %v1393_v25 = vpop.f32.mrb[30].mxu0  ;;  %v3959_v36 = vpop.f32.mrb[94].mxu1 }
 0x1b5   : > { %v1910_v57 = vadd.f32 %v3095_v34, %v3880_v28  ;;  %v3097_v47 = vadd.f32 %v1393_v25, %v3766_v1  ;;  %v1395_v32 = vpop.f32.mrb[31].mxu0  ;;  %v2204_v26 = vpack.c.bf16 %v1980_v43, %v1979_v29  ;;  %v3963_v58 = vpop.f32.mrb[95].mxu1 }
 0x1b6   : > { %v3098_v63 = vadd.f32 %v1395_v32, %v3768_v3  ;;  %v2020_v0 = vadd.f32 %v3096_v42, %v3844_v52 }
 0x1b7   : > { %v1949_v24 = vadd.f32 %v3839_v40, %v1910_v57  ;;  %v1911_v27 = vadd.f32 %v3097_v47, %v3887_v31  ;;  %3047 = vmatprep.mubr.bf16.mxu1 %v2204_v26 }
 0x1b8   : > { %v2021_v51 = vadd.f32 %v3098_v63, %v3844_v52 }
 0x1b9   : > { %v1950_v28 = vadd.f32 %v3839_v40, %v1911_v27  ;;  %v1981_v18 = vmax.f32 %v1949_v24, 0.0 }
 0x1ba   : > { %v2878_v59 = vpack.c.bf16 %v2021_v51, %v2020_v0  ;;  %v1399_v1 = vpop.f32.mrb[32].mxu0 }
 0x1bb   : > { %v1982_v16 = vmax.f32 %v1950_v28, 0.0  ;;  %v3099_v19 = vadd.f32 %v1399_v1, %v3770_v4  ;;  %v1401_v39 = vpop.f32.mrb[33].mxu0 }
 0x1bc   : > { %2926 = vst [vmem:[%s3855_s18 + $0x38] sm:$0xff] %v2878_v59   ;;  %v3100_v3 = vadd.f32 %v1401_v39, %v3772_v5  ;;  %v1403_v54 = vpop.f32.mrb[34].mxu0 }
 0x1bd   : > { %v3101_v31 = vadd.f32 %v1403_v54, %v3774_v6  ;;  %v1912_v46 = vadd.f32 %v3099_v19, %v3900_v50  ;;  %v1405_v2 = vpop.f32.mrb[35].mxu0  ;;  %v2205_v21 = vpack.c.bf16 %v1982_v16, %v1981_v18 }
 0x1be   : > { %v3102_v48 = vadd.f32 %v1405_v2, %v3776_v7  ;;  %v2022_v4 = vadd.f32 %v3100_v3, %v3844_v52 }
 0x1bf   : > { %v1951_v60 = vadd.f32 %v3839_v40, %v1912_v46  ;;  %v1913_v33 = vadd.f32 %v3101_v31, %v3907_v20  ;;  %3048 = vmatmul.mubr.bf16.gmra.mrb[108].mxu1 %v2205_v21  ;;  %v4114_v31 = vld [vmem:[#allocation2_spill] sm:$0xff] }
 0x1c0   : > { %v2023_v61 = vadd.f32 %v3102_v48, %v3844_v52 }
 0x1c1   : > { %v1952_v5 = vadd.f32 %v3839_v40, %v1913_v33  ;;  %v1983_v45 = vmax.f32 %v1951_v60, 0.0  ;;  %v4116_v60 = vld [vmem:[#allocation4_spill] sm:$0xff] }
 0x1c2   : > { %v2883_v22 = vpack.c.bf16 %v2023_v61, %v2022_v4  ;;  %v1409_v6 = vpop.f32.mrb[36].mxu0 }
 0x1c3   : > { %v1984_v50 = vmax.f32 %v1952_v5, 0.0  ;;  %v3103_v29 = vadd.f32 %v1409_v6, %v3778_v8  ;;  %v1411_v43 = vpop.f32.mrb[37].mxu0  ;;  %v4117_v5 = vld [vmem:[#allocation5_spill] sm:$0xff] }
 0x1c4   : > { %2927 = vst [vmem:[%s3855_s18 + $0x40] sm:$0xff] %v2883_v22   ;;  %v3104_v7 = vadd.f32 %v1411_v43, %v3780_v9  ;;  %v1413_v34 = vpop.f32.mrb[38].mxu0 }
 0x1c5   : > { %v1914_v20 = vadd.f32 %v3103_v29, %v3897_v49  ;;  %v3105_v62 = vadd.f32 %v1413_v34, %v3782_v10  ;;  %v1415_v42 = vpop.f32.mrb[39].mxu0  ;;  %v2206_v25 = vpack.c.bf16 %v1984_v50, %v1983_v45 }
 0x1c6   : > { %v3106_v57 = vadd.f32 %v1415_v42, %v3784_v11  ;;  %v2024_v8 = vadd.f32 %v3104_v7, %v3844_v52 }
 0x1c7   : > { %v1953_v47 = vadd.f32 %v3839_v40, %v1914_v20  ;;  %v1915_v32 = vadd.f32 %v3105_v62, %v3904_v44  ;;  %3051 = vmatprep.mubr.bf16.mxu1 %v2206_v25  ;;  %v4118_v62 = vld [vmem:[#allocation6_spill] sm:$0xff] }
 0x1c8   : > { %v2025_v26 = vadd.f32 %v3106_v57, %v3844_v52  ;;  %v4119_v57 = vld [vmem:[#allocation7_spill] sm:$0xff] }
 0x1c9   : > { %v1954_v9 = vadd.f32 %v3839_v40, %v1915_v32  ;;  %v1985_v24 = vmax.f32 %v1953_v47, 0.0 }
 0x1ca   : > { %v2888_v63 = vpack.c.bf16 %v2025_v26, %v2024_v8  ;;  %v1419_v49 = vpop.f32.mrb[40].mxu0  ;;  %v4120_v8 = vld [vmem:[#allocation8_spill] sm:$0xff] }
 0x1cb   : > { %v1986_v10 = vmax.f32 %v1954_v9, 0.0  ;;  %v3107_v27 = vadd.f32 %v1419_v49, %v3786_v12  ;;  %v1421_v0 = vpop.f32.mrb[41].mxu0  ;;  %v4121_v49 = vld [vmem:[#allocation9_spill] sm:$0xff] }
 0x1cc   : > { %2928 = vst [vmem:[%s3855_s18 + $0x48] sm:$0xff] %v2888_v63   ;;  %v3108_v11 = vadd.f32 %v1421_v0, %v3788_v13  ;;  %v1423_v51 = vpop.f32.mrb[42].mxu0 }
 0x1cd   : > { %v3109_v44 = vadd.f32 %v1423_v51, %v3790_v14  ;;  %v1916_v28 = vadd.f32 %v3107_v27, %v3917_v55  ;;  %v1425_v59 = vpop.f32.mrb[43].mxu0  ;;  %v2207_v1 = vpack.c.bf16 %v1986_v10, %v1985_v24 }
 0x1ce   : > { %v3110_v18 = vadd.f32 %v1425_v59, %v3792_v15  ;;  %v2026_v12 = vadd.f32 %v3108_v11, %v3844_v52  ;;  %v4115_v15 = vld [vmem:[#allocation3_spill] sm:$0xff] }
 0x1cf   : > { %v1955_v16 = vadd.f32 %v3839_v40, %v1916_v28  ;;  %v1917_v19 = vadd.f32 %v3109_v44, %v3925_v30  ;;  %3052 = vmatmul.mubr.bf16.gmra.mrb[112].mxu1 %v2207_v1  ;;  %v4122_v1 = vld [vmem:[#allocation10_spill] sm:$0xff] }
 0x1d0   : > { %v2027_v39 = vadd.f32 %v3110_v18, %v3844_v52 }
 0x1d1   : > { %v1956_v13 = vadd.f32 %v3839_v40, %v1917_v19  ;;  %v1987_v54 = vmax.f32 %v1955_v16, 0.0  ;;  %v4123_v19 = vld [vmem:[#allocation11_spill] sm:$0xff] }
 0x1d2   : > { %v2893_v3 = vpack.c.bf16 %v2027_v39, %v2026_v12  ;;  %v1429_v14 = vpop.f32.mrb[44].mxu0 }
 0x1d3   : > { %v1988_v55 = vmax.f32 %v1956_v13, 0.0  ;;  %v3111_v46 = vadd.f32 %v1429_v14, %v4114_v31  ;;  %v1431_v2 = vpop.f32.mrb[45].mxu0  ;;  %v4124_v13 = vld [vmem:[#allocation12_spill] sm:$0xff] }
 0x1d4   : > { %2929 = vst [vmem:[%s3855_s18 + $0x50] sm:$0xff] %v2893_v3   ;;  %v3112_v21 = vadd.f32 %v1431_v2, %v4115_v15  ;;  %v1433_v48 = vpop.f32.mrb[46].mxu0 }
 0x1d5   : > { %v1918_v30 = vadd.f32 %v3111_v46, %v3914_v38  ;;  %v3113_v33 = vadd.f32 %v1433_v48, %v4116_v60  ;;  %v1435_v4 = vpop.f32.mrb[47].mxu0  ;;  %v2208_v61 = vpack.c.bf16 %v1988_v55, %v1987_v54  ;;  %v4125_v55 = vld [vmem:[#allocation13_spill] sm:$0xff] }
 0x1d6   : > { %v3114_v22 = vadd.f32 %v1435_v4, %v4117_v5  ;;  %v2028_v50 = vadd.f32 %v3112_v21, %v3844_v52  ;;  %v4126_v4 = vld [vmem:[#allocation14_spill] sm:$0xff] }
 0x1d7   : > { %v1957_v6 = vadd.f32 %v3839_v40, %v1918_v30  ;;  %v1919_v45 = vadd.f32 %v3113_v33, %v3921_v35  ;;  %3055 = vmatprep.mubr.bf16.mxu1 %v2208_v61 }
 0x1d8   : > { %v2029_v29 = vadd.f32 %v3114_v22, %v3844_v52  ;;  %v4127_v22 = vld [vmem:[#allocation15_spill] sm:$0xff] }
 0x1d9   : > { %v1958_v43 = vadd.f32 %v3839_v40, %v1919_v45  ;;  %v1989_v34 = vmax.f32 %v1957_v6, 0.0 }
 0x1da   : > { %v2898_v7 = vpack.c.bf16 %v2029_v29, %v2028_v50  ;;  %v1439_v38 = vpop.f32.mrb[48].mxu0  ;;  %v4128_v50 = vld [vmem:[#allocation16_spill] sm:$0xff] }
 0x1db   : > { %v1990_v20 = vmax.f32 %v1958_v43, 0.0  ;;  %v3115_v42 = vadd.f32 %v1439_v38, %v4118_v62  ;;  %v1441_v25 = vpop.f32.mrb[49].mxu0  ;;  %v4129_v38 = vld [vmem:[#allocation17_spill] sm:$0xff] }
 0x1dc   : > { %2930 = vst [vmem:[%s3855_s18 + $0x58] sm:$0xff] %v2898_v7   ;;  %v3116_v47 = vadd.f32 %v1441_v25, %v4119_v57  ;;  %v1443_v32 = vpop.f32.mrb[50].mxu0 }
 0x1dd   : > { %v3117_v35 = vadd.f32 %v1443_v32, %v4120_v8  ;;  %v1920_v26 = vadd.f32 %v3115_v42, %v3936_v17  ;;  %v1445_v9 = vpop.f32.mrb[51].mxu0  ;;  %v2209_v63 = vpack.c.bf16 %v1990_v20, %v1989_v34 }
 0x1de   : > { %v3118_v24 = vadd.f32 %v1445_v9, %v4121_v49  ;;  %v2030_v0 = vadd.f32 %v3116_v47, %v3844_v52 }
 0x1df   : > { %v1959_v10 = vadd.f32 %v3839_v40, %v1920_v26  ;;  %v1921_v27 = vadd.f32 %v3117_v35, %v3944_v23  ;;  %3056 = vmatmul.mubr.bf16.gmra.mrb[116].mxu1 %v2209_v63  ;;  %v4130_v35 = vld [vmem:[#allocation18_spill] sm:$0xff]  ;;  %v4131_v63 = vld [vmem:[#allocation19_spill] sm:$0xff] }
 0x1e0   : > { %v2031_v11 = vadd.f32 %v3118_v24, %v3844_v52 }
 0x1e1   : > { %v1960_v51 = vadd.f32 %v3839_v40, %v1921_v27  ;;  %v1991_v59 = vmax.f32 %v1959_v10, 0.0  ;;  %v4132_v10 = vld [vmem:[#allocation20_spill] sm:$0xff] }
 0x1e2   : > { %v2903_v44 = vpack.c.bf16 %v2031_v11, %v2030_v0  ;;  %v1449_v28 = vpop.f32.mrb[52].mxu0 }
 0x1e3   : > { %v1992_v17 = vmax.f32 %v1960_v51, 0.0  ;;  %v3119_v18 = vadd.f32 %v1449_v28, %v4122_v1  ;;  %v1451_v16 = vpop.f32.mrb[53].mxu0  ;;  %v4133_v51 = vld [vmem:[#allocation21_spill] sm:$0xff] }
 0x1e4   : > { %2931 = vst [vmem:[%s3855_s18 + $0x60] sm:$0xff] %v2903_v44   ;;  %v3120_v12 = vadd.f32 %v1451_v16, %v4123_v19  ;;  %v1453_v39 = vpop.f32.mrb[54].mxu0 }
 0x1e5   : > { %v1922_v23 = vadd.f32 %v3119_v18, %v3933_v37  ;;  %v3121_v3 = vadd.f32 %v1453_v39, %v4124_v13  ;;  %v1455_v14 = vpop.f32.mrb[55].mxu0  ;;  %v2210_v54 = vpack.c.bf16 %v1992_v17, %v1991_v59 }
 0x1e6   : > { %v3122_v31 = vadd.f32 %v1455_v14, %v4125_v55  ;;  %v2032_v15 = vadd.f32 %v3120_v12, %v3844_v52 }
 0x1e7   : > { %v1961_v46 = vadd.f32 %v3839_v40, %v1922_v23  ;;  %v1923_v2 = vadd.f32 %v3121_v3, %v3940_v53  ;;  %3059 = vmatprep.mubr.bf16.mxu1 %v2210_v54 }
 0x1e8   : > { %v2033_v21 = vadd.f32 %v3122_v31, %v3844_v52 }
 0x1e9   : > { %v1962_v48 = vadd.f32 %v3839_v40, %v1923_v2  ;;  %v1993_v60 = vmax.f32 %v1961_v46, 0.0 }
 0x1ea   : > { %v2908_v30 = vpack.c.bf16 %v2033_v21, %v2032_v15  ;;  %v1459_v37 = vpop.f32.mrb[56].mxu0 }
 0x1eb   : > { %v1994_v33 = vmax.f32 %v1962_v48, 0.0  ;;  %v3123_v61 = vadd.f32 %v1459_v37, %v4126_v4  ;;  %v1461_v5 = vpop.f32.mrb[57].mxu0 }
 0x1ec   : > { %2932 = vst [vmem:[%s3855_s18 + $0x68] sm:$0xff] %v2908_v30   ;;  %v3124_v6 = vadd.f32 %v1461_v5, %v4127_v22  ;;  %v1463_v45 = vpop.f32.mrb[58].mxu0 }
 0x1ed   : > { %v3125_v53 = vadd.f32 %v1463_v45, %v4128_v50  ;;  %v1924_v29 = vadd.f32 %v3123_v61, %v3955_v56  ;;  %v1465_v43 = vpop.f32.mrb[59].mxu0  ;;  %v2211_v7 = vpack.c.bf16 %v1994_v33, %v1993_v60 }
 0x1ee   : > { %v3126_v34 = vadd.f32 %v1465_v43, %v4129_v38  ;;  %v2034_v42 = vadd.f32 %v3124_v6, %v3844_v52 }
 0x1ef   : > { %v1963_v20 = vadd.f32 %v3839_v40, %v1924_v29  ;;  %v1925_v62 = vadd.f32 %v3125_v53, %v3963_v58  ;;  %3060 = vmatmul.mubr.bf16.gmra.mrb[120].mxu1 %v2211_v7 }
 0x1f0   : > { %v2035_v25 = vadd.f32 %v3126_v34, %v3844_v52 }
 0x1f1   : > { %v1964_v57 = vadd.f32 %v3839_v40, %v1925_v62  ;;  %v1995_v8 = vmax.f32 %v1963_v20, 0.0 }
 0x1f2   : > { %v2913_v47 = vpack.c.bf16 %v2035_v25, %v2034_v42  ;;  %v1469_v32 = vpop.f32.mrb[60].mxu0 }
 0x1f3   : > { %v1996_v56 = vmax.f32 %v1964_v57, 0.0  ;;  %v3127_v26 = vadd.f32 %v1469_v32, %v4130_v35  ;;  %v1471_v9 = vpop.f32.mrb[61].mxu0 }
 0x1f4   : > { %2933 = vst [vmem:[%s3855_s18 + $0x70] sm:$0xff] %v2913_v47   ;;  %v3128_v49 = vadd.f32 %v1471_v9, %v4131_v63  ;;  %v1473_v24 = vpop.f32.mrb[62].mxu0 }
 0x1f5   : > { %v1926_v58 = vadd.f32 %v3127_v26, %v3952_v41  ;;  %v3129_v27 = vadd.f32 %v1473_v24, %v4132_v10  ;;  %v1475_v0 = vpop.f32.mrb[63].mxu0  ;;  %v2212_v11 = vpack.c.bf16 %v1996_v56, %v1995_v8 }
 0x1f6   : > { %v3130_v44 = vadd.f32 %v1475_v0, %v4133_v51  ;;  %v2036_v17 = vadd.f32 %v3128_v49, %v3844_v52 }
 0x1f7   : > { %v1965_v28 = vadd.f32 %v3839_v40, %v1926_v58  ;;  %v1927_v59 = vadd.f32 %v3129_v27, %v3959_v36  ;;  %3063 = vmatprep.mubr.bf16.mxu1 %v2212_v11 }
 0x1f8   : > { %v2037_v1 = vadd.f32 %v3130_v44, %v3844_v52 }
 0x1f9   : > { %v1966_v18 = vadd.f32 %v3839_v40, %v1927_v59  ;;  %v1997_v41 = vmax.f32 %v1965_v28, 0.0 }
 0x1fa   : > { %v2918_v16 = vpack.c.bf16 %v2037_v1, %v2036_v17 }
 0x1fb   : > { %v1998_v19 = vmax.f32 %v1966_v18, 0.0 }
 0x1fc   : > { %2934 = vst [vmem:[%s3855_s18 + $0x78] sm:$0xff] %v2918_v16  }
 0x1fd   : > { %v2213_v12 = vpack.c.bf16 %v1998_v19, %v1997_v41 }
 0x1ff   : > { %3064 = vmatmul.mubr.bf16.gmra.mrb[124].mxu1 %v2213_v12 }
 0x262   : > { %v3037_v39 = vpop.f32.mrb[96].mxu1 }
 0x263   : > { %v2312_v23 = vpop.f32.mrb[97].mxu1 }
 0x264   : > { %v3038_v52 = vpop.f32.mrb[98].mxu1 }
 0x265   : > { %v2440_v36 = vpack.c.bf16 %v3038_v52, %v3037_v39  ;;  %v2315_v40 = vpop.f32.mrb[99].mxu1 }
 0x266   : > { %v2439_v13 = vpack.c.bf16 %v2315_v40, %v2312_v23 }
 0x267   : > { %2456 = vst [vmem:[%s4064_s21 + $0x8] sm:$0xff] %v2440_v36 }
 0x268   : > { %2455 = vst [vmem:[%s4064_s21] sm:$0xff] %v2439_v13 }
 0x272   : > { %v3041_v3 = vpop.f32.mrb[100].mxu1 }
 0x273   : > { %v2328_v14 = vpop.f32.mrb[101].mxu1 }
 0x274   : > { %v3042_v54 = vpop.f32.mrb[102].mxu1 }
 0x275   : > { %v2442_v55 = vpack.c.bf16 %v3042_v54, %v3041_v3  ;;  %v2331_v31 = vpop.f32.mrb[103].mxu1 }
 0x276   : > { %v2441_v46 = vpack.c.bf16 %v2331_v31, %v2328_v14 }
 0x277   : > { %2458 = vst [vmem:[%s4064_s21 + $0x18] sm:$0xff] %v2442_v55 }
 0x278   : > { %2457 = vst [vmem:[%s4064_s21 + $0x10] sm:$0xff] %v2441_v46 }
 0x282   : > { %v3045_v2 = vpop.f32.mrb[104].mxu1 }
 0x283   : > { %v2344_v15 = vpop.f32.mrb[105].mxu1 }
 0x284   : > { %v3046_v21 = vpop.f32.mrb[106].mxu1 }
 0x285   : > { %v2444_v48 = vpack.c.bf16 %v3046_v21, %v3045_v2  ;;  %v2347_v30 = vpop.f32.mrb[107].mxu1 }
 0x286   : > { %v2443_v37 = vpack.c.bf16 %v2347_v30, %v2344_v15 }
 0x287   : > { %2460 = vst [vmem:[%s4064_s21 + $0x28] sm:$0xff] %v2444_v48 }
 0x288   : > { %2459 = vst [vmem:[%s4064_s21 + $0x20] sm:$0xff] %v2443_v37 }
 0x292   : > { %v3049_v60 = vpop.f32.mrb[108].mxu1 }
 0x293   : > { %v2360_v33 = vpop.f32.mrb[109].mxu1 }
 0x294   : > { %v3050_v4 = vpop.f32.mrb[110].mxu1 }
 0x295   : > { %v2446_v61 = vpack.c.bf16 %v3050_v4, %v3049_v60  ;;  %v2363_v5 = vpop.f32.mrb[111].mxu1 }
 0x296   : > { %v2445_v22 = vpack.c.bf16 %v2363_v5, %v2360_v33 }
 0x297   : > { %2462 = vst [vmem:[%s4064_s21 + $0x38] sm:$0xff] %v2446_v61 }
 0x298   : > { %2461 = vst [vmem:[%s4064_s21 + $0x30] sm:$0xff] %v2445_v22 }
 0x2a2   : > { %v3053_v6 = vpop.f32.mrb[112].mxu1 }
 0x2a3   : > { %v2376_v45 = vpop.f32.mrb[113].mxu1 }
 0x2a4   : > { %v3054_v50 = vpop.f32.mrb[114].mxu1 }
 0x2a5   : > { %v2448_v53 = vpack.c.bf16 %v3054_v50, %v3053_v6  ;;  %v2379_v29 = vpop.f32.mrb[115].mxu1 }
 0x2a6   : > { %v2447_v43 = vpack.c.bf16 %v2379_v29, %v2376_v45 }
 0x2a7   : > { %2464 = vst [vmem:[%s4064_s21 + $0x48] sm:$0xff] %v2448_v53 }
 0x2a8   : > { %2463 = vst [vmem:[%s4064_s21 + $0x40] sm:$0xff] %v2447_v43 }
 0x2b2   : > { %v3057_v7 = vpop.f32.mrb[116].mxu1 }
 0x2b3   : > { %v2392_v38 = vpop.f32.mrb[117].mxu1 }
 0x2b4   : > { %v3058_v34 = vpop.f32.mrb[118].mxu1 }
 0x2b5   : > { %v2450_v20 = vpack.c.bf16 %v3058_v34, %v3057_v7  ;;  %v2395_v62 = vpop.f32.mrb[119].mxu1 }
 0x2b6   : > { %v2449_v42 = vpack.c.bf16 %v2395_v62, %v2392_v38 }
 0x2b7   : > { %2466 = vst [vmem:[%s4064_s21 + $0x58] sm:$0xff] %v2450_v20 }
 0x2b8   : > { %2465 = vst [vmem:[%s4064_s21 + $0x50] sm:$0xff] %v2449_v42 }
 0x2c2   : > { %v3061_v25 = vpop.f32.mrb[120].mxu1 }
 0x2c3   : > { %v2408_v57 = vpop.f32.mrb[121].mxu1 }
 0x2c4   : > { %v3062_v47 = vpop.f32.mrb[122].mxu1 }
 0x2c5   : > { %v2452_v32 = vpack.c.bf16 %v3062_v47, %v3061_v25  ;;  %v2411_v8 = vpop.f32.mrb[123].mxu1 }
 0x2c6   : > { %v2451_v56 = vpack.c.bf16 %v2411_v8, %v2408_v57 }
 0x2c7   : > { %2468 = vst [vmem:[%s4064_s21 + $0x68] sm:$0xff] %v2452_v32 }
 0x2c8   : > { %2467 = vst [vmem:[%s4064_s21 + $0x60] sm:$0xff] %v2451_v56 }
 0x2d2   : > { %v3065_v35 = vpop.f32.mrb[124].mxu1 }
 0x2d3   : > { %v2424_v26 = vpop.f32.mrb[125].mxu1 }
 0x2d4   : > { %v3066_v9 = vpop.f32.mrb[126].mxu1 }
 0x2d5   : > { %v2454_v63 = vpack.c.bf16 %v3066_v9, %v3065_v35  ;;  %v2427_v49 = vpop.f32.mrb[127].mxu1 }
 0x2d6   : > { %v2453_v24 = vpack.c.bf16 %v2427_v49, %v2424_v26 }
 0x2d7   : > { %2470 = vst [vmem:[%s4064_s21 + $0x78] sm:$0xff] %v2454_v63 }
 0x2d8   : > { %2469 = vst [vmem:[%s4064_s21 + $0x70] sm:$0xff] %v2453_v24 }
 0x2d9 PF: > { %s19_s27 = sadd.s32 1, %s3327_s27  }
 0x2da   : > { %p16_p4 = scmp.ge.s32.totalorder %s19_s27, 4  }
 0x2dc   :  { %18 = sbr.rel (!%p16_p4) target bundleno = 1 (0x1), region = 95 }

// kernel: _lambda_.2
= control target key start
LH: loop header
LB: loop body
LE: loop exit
PB: predicated region body
PF: predicated region fallthrough
CT: control target
= control target key end

     0   :  { %s2088_s12 = smov 0   ;;  %s2405_s0 = inlined_call_operand.vmem [shape: bf16[2,96,384], index: 0, kind: input, shape index: {}]   ;;  %s2406_s1 = inlined_call_operand.vmem [shape: bf16[3,384,128], index: 1, kind: input, shape index: {}]   ;;  %s2407_s2 = inlined_call_operand.vmem [shape: f32[1,128], index: 2, kind: input, shape index: {}]   ;;  %s2408_s3 = inlined_call_operand.vmem [shape: bf16[2,64,128], index: 3, kind: output, shape index: {}]  }
   0x1 LB: > { %s1438_s13 = sadd.s32 4294967295, %s2066_s12   ;;  %p1442_p0 = scmp.ge.s32.totalorder %s2066_s12, 1  ;;  %s2066_s12 = sphi %s2088_s12, %s13_s12  }
   0x2   : > { %p137_p1 = scmp.lt.s32.totalorder %s2066_s12, 3 }
   0x4   : > { %p138_p2 = pnand %p1442_p0, %p137_p1 }
   0x5   : > { %v1961_v0 = vld [vmem:[%s2406_s1 + $0x100] sm:$0xff] (!%p138_p2)   ;;  %v1964_v3 = vld [vmem:[%s2406_s1 + $0x108] sm:$0xff] (!%p138_p2)   ;;  %v1967_v6 = vld [vmem:[%s2406_s1 + $0x110] sm:$0xff] (!%p138_p2)   ;;  %p161_p3 = scmp.lt.s32.totalorder (!%p138_p2), %s1438_s13, 1 }
   0x6   : > { %141 = sbr.rel (%p138_p2) target bundleno = 353 (0x161), region = 32  ;;  %v1962_v1 = vld [vmem:[%s2406_s1 + $0x140] sm:$0xff] (!%p138_p2)   ;;  %1684 = vmatprep.subr.bf16.mxu0 (!%p138_p2), %v1961_v0  ;;  %v1965_v4 = vld [vmem:[%s2406_s1 + $0x148] sm:$0xff] (!%p138_p2)   ;;  %v1968_v7 = vld [vmem:[%s2406_s1 + $0x150] sm:$0xff] (!%p138_p2)  }
   0x7   : > { %v1963_v2 = vld [vmem:[%s2406_s1 + $0xc0] sm:$0xff] (!%p138_p2)   ;;  %1840 = vmatprep.subr.bf16.mxu1 (!%p138_p2), %v1962_v1  ;;  %v1966_v5 = vld [vmem:[%s2406_s1 + $0xc8] sm:$0xff] (!%p138_p2)   ;;  %v1969_v8 = vld [vmem:[%s2406_s1 + $0xd0] sm:$0xff] (!%p138_p2)  }
   0x8   : > { %1685 = vmatpush3.bf16.msra.mxu0 (!%p138_p2), %v1963_v2  ;;  %1841 = vmatpush3.bf16.msra.mxu1 (!%p138_p2), %v1962_v1  ;;  %v1970_v9 = vld [vmem:[%s2406_s1 + $0x118] sm:$0xff] (!%p138_p2)   ;;  %v1973_v12 = vld [vmem:[%s2406_s1 + $0x120] sm:$0xff] (!%p138_p2)   ;;  %v1976_v15 = vld [vmem:[%s2406_s1 + $0x128] sm:$0xff] (!%p138_p2)  }
   0x9   : > { %1686 = vmatprep.subr.bf16.mxu0 (!%p138_p2), %v1964_v3  ;;  %1842 = vmatprep.subr.bf16.mxu1 (!%p138_p2), %v1965_v4  ;;  %v1971_v10 = vld [vmem:[%s2406_s1 + $0x158] sm:$0xff] (!%p138_p2)   ;;  %v1974_v13 = vld [vmem:[%s2406_s1 + $0x160] sm:$0xff] (!%p138_p2)   ;;  %v1977_v16 = vld [vmem:[%s2406_s1 + $0x168] sm:$0xff] (!%p138_p2)  }
   0xa   : > { %v1972_v11 = vld [vmem:[%s2406_s1 + $0xd8] sm:$0xff] (!%p138_p2)   ;;  %v1975_v14 = vld [vmem:[%s2406_s1 + $0xe0] sm:$0xff] (!%p138_p2)   ;;  %v1978_v17 = vld [vmem:[%s2406_s1 + $0xe8] sm:$0xff] (!%p138_p2)  }
   0xb   : > { %v1979_v18 = vld [vmem:[%s2406_s1 + $0x130] sm:$0xff] (!%p138_p2)   ;;  %v1982_v21 = vld [vmem:[%s2406_s1 + $0x138] sm:$0xff] (!%p138_p2)   ;;  %v1989_v26 = vld [vmem:[%s2406_s1 + $0x40] sm:$0xff] (!%p138_p2)  }
   0xc   : > { %1687 = vmatpush3.bf16.msra.mxu0 (!%p138_p2), %v1966_v5  ;;  %1843 = vmatpush3.bf16.msra.mxu1 (!%p138_p2), %v1965_v4  ;;  %v1980_v19 = vld [vmem:[%s2406_s1 + $0x170] sm:$0xff] (!%p138_p2)   ;;  %v1983_v22 = vld [vmem:[%s2406_s1 + $0x178] sm:$0xff] (!%p138_p2)   ;;  %v1990_v28 = vld [vmem:[%s2406_s1 + $0x80] sm:$0xff] (!%p138_p2)  }
   0xd   : > { %1688 = vmatprep.subr.bf16.mxu0 %v1967_v6  ;;  %1844 = vmatprep.subr.bf16.mxu1 %v1968_v7  ;;  %s2410_s13 = smov (!%p161_p3, %s1438_s13), 1  ;;  %v1981_v20 = vld [vmem:[%s2406_s1 + $0xf0] sm:$0xff]   ;;  %v1984_v25 = vld [vmem:[%s2406_s1 + $0xf8] sm:$0xff]   ;;  %v1992_v30 = vld [vmem:[%s2406_s1] sm:$0xff]  }
   0xe   : > { %s1952_s23 = smul.u32 144, %s2410_s13  ;;  %v1993_v31 = vld [vmem:[%s2406_s1 + $0x48] sm:$0xff]   ;;  %v1999_v35 = vld [vmem:[%s2406_s1 + $0x50] sm:$0xff]   ;;  %v2002_v39 = vld [vmem:[%s2406_s1 + $0x58] sm:$0xff]   ;;  %s1652_s17 = sshll.u32 %s2410_s13, 5 }
   0xf   : > { %v1994_v32 = vld [vmem:[%s2406_s1 + $0x88] sm:$0xff]   ;;  %v2000_v36 = vld [vmem:[%s2406_s1 + $0x90] sm:$0xff]   ;;  %v2003_v40 = vld [vmem:[%s2406_s1 + $0x98] sm:$0xff]   ;;  %s2396_s20 = scalar_lea.vmem %s2408_s3, %s1652_s17 }
  0x10   : > { %1689 = vmatpush3.bf16.msra.mxu0 %v1969_v8  ;;  %1845 = vmatpush3.bf16.msra.mxu1 %v1968_v7  ;;  %s2169_s7 = scalar_lea.vmem %s2405_s0, %s1952_s23  ;;  %v1995_v34 = vld [vmem:[%s2406_s1 + $0x8] sm:$0xff]   ;;  %v2001_v38 = vld [vmem:[%s2406_s1 + $0x10] sm:$0xff]   ;;  %v2004_v42 = vld [vmem:[%s2406_s1 + $0x18] sm:$0xff]  }
  0x11   : > { %1690 = vmatprep.subr.bf16.mxu0 %v1970_v9  ;;  %1846 = vmatprep.subr.bf16.mxu1 %v1971_v10  ;;  %v2178_v23 = vld [vmem:[%s2169_s7 + $0x1c] ss:$12 sps:$4 sm:$0xff]   ;;  %v2181_v24 = vld [vmem:[%s2169_s7 + $0x20] ss:$12 sps:$4 sm:$0xff]   ;;  %v2191_v27 = vld [vmem:[%s2169_s7 + $0x18] ss:$12 sps:$4 sm:$0xff]  }
  0x12   : > { %529 = vmatprep.mubr.bf16.mxu0 %v2178_v23  ;;  %1856 = vmatprep.mubr.bf16.mxu1 %v2181_v24  ;;  %v2198_v29 = vld [vmem:[%s2169_s7 + $0x38] ss:$12 sps:$4 sm:$0xff]   ;;  %v2210_v33 = vld [vmem:[%s2169_s7 + $0x34] ss:$12 sps:$4 sm:$0xff]   ;;  %v2225_v37 = vld [vmem:[%s2169_s7 + $0x30] ss:$12 sps:$4 sm:$0xff]  }
  0x13   : > { %v2237_v41 = vld [vmem:[%s2169_s7 + $0x4c] ss:$12 sps:$4 sm:$0xff]   ;;  %v2008_v43 = vld [vmem:[%s2406_s1 + $0x60] sm:$0xff]   ;;  %v2247_v44 = vld [vmem:[%s2169_s7 + $0x48] ss:$12 sps:$4 sm:$0xff]  }
  0x14   : > { %1691 = vmatpush3.bf16.msra.mxu0 %v1972_v11  ;;  %1847 = vmatpush3.bf16.msra.mxu1 %v1971_v10  ;;  %v2009_v45 = vld [vmem:[%s2406_s1 + $0xa0] sm:$0xff]   ;;  %v2011_v47 = vld [vmem:[%s2406_s1 + $0x68] sm:$0xff]   ;;  %v2017_v51 = vld [vmem:[%s2169_s7 + $0x50] ss:$12 sps:$4 sm:$0xff]  }
  0x15   : > { %1692 = vmatprep.subr.bf16.mxu0 %v1973_v12  ;;  %1848 = vmatprep.subr.bf16.mxu1 %v1974_v13  ;;  %v2010_v46 = vld [vmem:[%s2406_s1 + $0x20] sm:$0xff]   ;;  %v2012_v48 = vld [vmem:[%s2406_s1 + $0xa8] sm:$0xff]   ;;  %v2018_v52 = vld [vmem:[%s2406_s1 + $0x70] sm:$0xff]  }
  0x16   : > { %v2263_v49 = vld [vmem:[%s2169_s7 + $0x64] ss:$12 sps:$4 sm:$0xff]   ;;  %v2013_v50 = vld [vmem:[%s2406_s1 + $0x28] sm:$0xff]   ;;  %v2022_v57 = vld [vmem:[%s2406_s1 + $0x78] sm:$0xff]  }
  0x17   : > { %v2019_v53 = vld [vmem:[%s2406_s1 + $0xb0] sm:$0xff]   ;;  %v2279_v55 = vld [vmem:[%s2169_s7 + $0x60] ss:$12 sps:$4 sm:$0xff]   ;;  %v2023_v58 = vld [vmem:[%s2406_s1 + $0xb8] sm:$0xff]  }
  0x18   : > { %1693 = vmatpush3.bf16.msra.mxu0 %v1975_v14  ;;  %1849 = vmatpush3.bf16.msra.mxu1 %v1974_v13  ;;  %v2020_v54 = vld [vmem:[%s2169_s7 + $0x68] ss:$12 sps:$4 sm:$0xff]   ;;  %v2024_v59 = vld [vmem:[%s2406_s1 + $0x38] sm:$0xff]   ;;  %v2027_v60 = vld [vmem:[%s2169_s7 + $0x4] ss:$12 sps:$4 sm:$0xff]  }
  0x19   : > { %1694 = vmatprep.subr.bf16.mxu0 %v1976_v15  ;;  %1850 = vmatprep.subr.bf16.mxu1 %v1977_v16  ;;  %v2021_v56 = vld [vmem:[%s2406_s1 + $0x30] sm:$0xff]   ;;  %v2029_v62 = vld [vmem:[%s2406_s1 + $0x1c0] sm:$0xff]   ;;  %v2032_v2 = vld [vmem:[%s2406_s1 + $0x1c8] sm:$0xff]  }
  0x1a   : > { %v2028_v61 = vld [vmem:[%s2169_s7 + $0x8] ss:$12 sps:$4 sm:$0xff]   ;;  %v2030_v63 = vld [vmem:[%s2406_s1 + $0x200] sm:$0xff]   ;;  %v2038_v8 = vld [vmem:[%s2406_s1 + $0x1d8] sm:$0xff]  }
  0x1b   : > { %v2025_v0 = vld [vmem:[%s2169_s7] ss:$12 sps:$4 sm:$0xff]   ;;  %v2035_v5 = vld [vmem:[%s2406_s1 + $0x1d0] sm:$0xff]   ;;  %v2039_v9 = vld [vmem:[%s2406_s1 + $0x218] sm:$0xff]  }
  0x1c   : > { %1695 = vmatpush3.bf16.msra.mxu0 %v1978_v17  ;;  %1851 = vmatpush3.bf16.msra.mxu1 %v1977_v16  ;;  %v2031_v1 = vld [vmem:[%s2406_s1 + $0x180] sm:$0xff]   ;;  %v2033_v3 = vld [vmem:[%s2406_s1 + $0x208] sm:$0xff]   ;;  %v2036_v6 = vld [vmem:[%s2406_s1 + $0x210] sm:$0xff]  }
  0x1d   : > { %1696 = vmatprep.subr.bf16.mxu0 %v1979_v18  ;;  %1852 = vmatprep.subr.bf16.mxu1 %v1980_v19  ;;  %v2034_v4 = vld [vmem:[%s2406_s1 + $0x188] sm:$0xff]   ;;  %v2037_v7 = vld [vmem:[%s2406_s1 + $0x190] sm:$0xff]   ;;  %v2040_v10 = vld [vmem:[%s2406_s1 + $0x198] sm:$0xff]  }
  0x1e   : > { %v2041_v11 = vld [vmem:[%s2406_s1 + $0x1e0] sm:$0xff]   ;;  %v2044_v14 = vld [vmem:[%s2406_s1 + $0x1e8] sm:$0xff]   ;;  %v2047_v17 = vld [vmem:[%s2406_s1 + $0x1f0] sm:$0xff]  }
  0x1f   : > { %v2042_v12 = vld [vmem:[%s2406_s1 + $0x220] sm:$0xff]   ;;  %v2045_v15 = vld [vmem:[%s2406_s1 + $0x228] sm:$0xff]  }
  0x20   : > { %1697 = vmatpush3.bf16.msra.mxu0 %v1981_v20  ;;  %1853 = vmatpush3.bf16.msra.mxu1 %v1980_v19  ;;  %v2043_v13 = vld [vmem:[%s2406_s1 + $0x1a0] sm:$0xff]   ;;  %v2046_v16 = vld [vmem:[%s2406_s1 + $0x1a8] sm:$0xff]   ;;  %v2048_v19 = vld [vmem:[%s2406_s1 + $0x230] sm:$0xff]  }
  0x21   : > { %1698 = vmatprep.subr.bf16.mxu0 %v1982_v21  ;;  %1854 = vmatprep.subr.bf16.mxu1 %v1983_v22  ;;  %v2053_v18 = vld [vmem:[%s2169_s7 + $0x38] ss:$12 sps:$4 sm:$0xff]   ;;  %v2049_v20 = vld [vmem:[%s2406_s1 + $0x1b0] sm:$0xff]  }
  0x22   : > { %v2050_v21 = vld [vmem:[%s2406_s1 + $0x1f8] sm:$0xff]  }
  0x24   : > { %1699 = vmatpush3.bf16.msra.mxu0 %v1984_v25  ;;  %1855 = vmatpush3.bf16.msra.mxu1 %v1983_v22  ;;  %v2051_v22 = vld [vmem:[%s2406_s1 + $0x238] sm:$0xff]   ;;  %v2055_v25 = vld [vmem:[%s2169_s7 + $0x68] ss:$12 sps:$4 sm:$0xff]  }
  0x25   : > { %1736 = vmatprep.subr.bf16.mxu0 %v1989_v26  ;;  %1864 = vmatprep.subr.bf16.mxu1 %v1990_v28  ;;  %v2056_v26 = vld [vmem:[%s2169_s7 + $0x80] ss:$12 sps:$4 sm:$0xff]  }
  0x27   : > { %530 = vmatmul.mubr.bf16.vlgmr.msra.gmra.mrb[0].mxu0 %v2191_v27  ;;  %1857 = vmatmul.mubr.bf16.vlgmr.msra.gmra.mrb[0].mxu1 %v2198_v29 }
  0x28   : > { %1737 = vmatpush3.bf16.msra.mxu0 %v1992_v30  ;;  %1865 = vmatpush3.bf16.msra.mxu1 %v1990_v28  ;;  %v2059_v28 = vld [vmem:[%s2169_s7 + $0x78] ss:$12 sps:$4 sm:$0xff]  }
  0x29   : > { %1738 = vmatprep.subr.bf16.mxu0 %v1993_v31  ;;  %1866 = vmatprep.subr.bf16.mxu1 %v1994_v32 }
  0x2a   : > { %537 = vmatprep.mubr.bf16.mxu0 %v2210_v33  ;;  %1860 = vmatprep.mubr.bf16.mxu1 %v2017_v51 }
  0x2c   : > { %1739 = vmatpush3.bf16.msra.mxu0 %v1995_v34  ;;  %1867 = vmatpush3.bf16.msra.mxu1 %v1994_v32 }
  0x2d   : > { %1740 = vmatprep.subr.bf16.mxu0 %v1999_v35  ;;  %1868 = vmatprep.subr.bf16.mxu1 %v2000_v36 }
  0x2f   : > { %538 = vmatmul.mubr.bf16.gmra.mrb[4].mxu0 %v2225_v37  ;;  %1861 = vmatmul.mubr.bf16.gmra.mrb[4].mxu1 %v2020_v54 }
  0x30   : > { %1741 = vmatpush3.bf16.msra.mxu0 %v2001_v38  ;;  %1869 = vmatpush3.bf16.msra.mxu1 %v2000_v36 }
  0x31   : > { %1742 = vmatprep.subr.bf16.mxu0 %v2002_v39  ;;  %1870 = vmatprep.subr.bf16.mxu1 %v2003_v40 }
  0x32   : > { %545 = vmatprep.mubr.bf16.mxu0 %v2237_v41  ;;  %1880 = vmatprep.mubr.bf16.mxu1 %v2028_v61 }
  0x34   : > { %1743 = vmatpush3.bf16.msra.mxu0 %v2004_v42  ;;  %1871 = vmatpush3.bf16.msra.mxu1 %v2003_v40 }
  0x35   : > { %1744 = vmatprep.subr.bf16.mxu0 %v2008_v43  ;;  %1872 = vmatprep.subr.bf16.mxu1 %v2009_v45 }
  0x37   : > { %546 = vmatmul.mubr.bf16.gmra.mrb[8].mxu0 %v2247_v44 }
  0x38   : > { %1745 = vmatpush3.bf16.msra.mxu0 %v2010_v46  ;;  %1873 = vmatpush3.bf16.msra.mxu1 %v2009_v45 }
  0x39   : > { %1746 = vmatprep.subr.bf16.mxu0 %v2011_v47  ;;  %1874 = vmatprep.subr.bf16.mxu1 %v2012_v48 }
  0x3a   : > { %553 = vmatprep.mubr.bf16.mxu0 %v2263_v49 }
  0x3c   : > { %1747 = vmatpush3.bf16.msra.mxu0 %v2013_v50  ;;  %1875 = vmatpush3.bf16.msra.mxu1 %v2012_v48 }
  0x3d   : > { %1748 = vmatprep.subr.bf16.mxu0 %v2018_v52  ;;  %1876 = vmatprep.subr.bf16.mxu1 %v2019_v53 }
  0x3f   : > { %554 = vmatmul.mubr.bf16.gmra.mrb[12].mxu0 %v2279_v55 }
  0x40   : > { %1749 = vmatpush3.bf16.msra.mxu0 %v2021_v56  ;;  %1877 = vmatpush3.bf16.msra.mxu1 %v2019_v53 }
  0x41   : > { %1750 = vmatprep.subr.bf16.mxu0 %v2022_v57  ;;  %1878 = vmatprep.subr.bf16.mxu1 %v2023_v58 }
  0x42   : > { %819 = vmatprep.mubr.bf16.mxu0 %v2027_v60 }
  0x44   : > { %1751 = vmatpush3.bf16.msra.mxu0 %v2024_v59  ;;  %1879 = vmatpush3.bf16.msra.mxu1 %v2023_v58 }
  0x45   : > { %1788 = vmatprep.subr.bf16.mxu0 %v2029_v62  ;;  %1888 = vmatprep.subr.bf16.mxu1 %v2030_v63 }
  0x47   : > { %820 = vmatmul.mubr.bf16.vlgmr.msra.gmra.mrb[16].mxu0 %v2025_v0  ;;  %1881 = vmatmul.mubr.bf16.vlgmr.msra.gmra.mrb[0].mxu1 %v2181_v24  ;;  %v2054_v24 = vld [vmem:[%s2169_s7 + $0x50] ss:$12 sps:$4 sm:$0xff]  }
  0x48   : > { %1789 = vmatpush3.bf16.msra.mxu0 %v2031_v1  ;;  %1889 = vmatpush3.bf16.msra.mxu1 %v2030_v63 }
  0x49   : > { %1790 = vmatprep.subr.bf16.mxu0 %v2032_v2  ;;  %1890 = vmatprep.subr.bf16.mxu1 %v2033_v3 }
  0x4a   : > { %827 = vmatprep.mubr.bf16.mxu0 %v2178_v23  ;;  %1884 = vmatprep.mubr.bf16.mxu1 %v2198_v29  ;;  %v2052_v23 = vld [vmem:[%s2406_s1 + $0x1b8] sm:$0xff]  }
  0x4c   : > { %1791 = vmatpush3.bf16.msra.mxu0 %v2034_v4  ;;  %1891 = vmatpush3.bf16.msra.mxu1 %v2033_v3 }
  0x4d   : > { %1792 = vmatprep.subr.bf16.mxu0 %v2035_v5  ;;  %1892 = vmatprep.subr.bf16.mxu1 %v2036_v6 }
  0x4f   : > { %828 = vmatmul.mubr.bf16.gmra.mrb[20].mxu0 %v2191_v27  ;;  %1885 = vmatmul.mubr.bf16.gmra.mrb[4].mxu1 %v2017_v51  ;;  %v2057_v27 = vld [vmem:[%s2169_s7 + $0x7c] ss:$12 sps:$4 sm:$0xff]  }
  0x50   : > { %1793 = vmatpush3.bf16.msra.mxu0 %v2037_v7  ;;  %1893 = vmatpush3.bf16.msra.mxu1 %v2036_v6 }
  0x51   : > { %1794 = vmatprep.subr.bf16.mxu0 %v2038_v8  ;;  %1894 = vmatprep.subr.bf16.mxu1 %v2039_v9 }
  0x52   : > { %835 = vmatprep.mubr.bf16.mxu0 %v2210_v33  ;;  %1904 = vmatprep.mubr.bf16.mxu1 %v2053_v18 }
  0x54   : > { %1795 = vmatpush3.bf16.msra.mxu0 %v2040_v10  ;;  %1895 = vmatpush3.bf16.msra.mxu1 %v2039_v9 }
  0x55   : > { %1796 = vmatprep.subr.bf16.mxu0 %v2041_v11  ;;  %1896 = vmatprep.subr.bf16.mxu1 %v2042_v12 }
  0x57   : > { %836 = vmatmul.mubr.bf16.gmra.mrb[24].mxu0 %v2225_v37 }
  0x58   : > { %1797 = vmatpush3.bf16.msra.mxu0 %v2043_v13  ;;  %1897 = vmatpush3.bf16.msra.mxu1 %v2042_v12 }
  0x59   : > { %1798 = vmatprep.subr.bf16.mxu0 %v2044_v14  ;;  %1898 = vmatprep.subr.bf16.mxu1 %v2045_v15 }
  0x5a   : > { %843 = vmatprep.mubr.bf16.mxu0 %v2237_v41 }
  0x5c   : > { %1799 = vmatpush3.bf16.msra.mxu0 %v2046_v16  ;;  %1899 = vmatpush3.bf16.msra.mxu1 %v2045_v15 }
  0x5d   : > { %1800 = vmatprep.subr.bf16.mxu0 %v2047_v17  ;;  %1900 = vmatprep.subr.bf16.mxu1 %v2048_v19 }
  0x5f   : > { %844 = vmatmul.mubr.bf16.gmra.mrb[28].mxu0 %v2247_v44 }
  0x60   : > { %1801 = vmatpush3.bf16.msra.mxu0 %v2049_v20  ;;  %1901 = vmatpush3.bf16.msra.mxu1 %v2048_v19 }
  0x61   : > { %1802 = vmatprep.subr.bf16.mxu0 %v2050_v21  ;;  %1902 = vmatprep.subr.bf16.mxu1 %v2051_v22 }
  0x62   : > { %1222 = vmatprep.mubr.bf16.mxu0 %v2210_v33 }
  0x64   : > { %1803 = vmatpush3.bf16.msra.mxu0 %v2052_v23  ;;  %1903 = vmatpush3.bf16.msra.mxu1 %v2051_v22 }
  0x67   : > { %1223 = vmatmul.mubr.bf16.vlgmr.msra.gmra.mrb[32].mxu0 %v2225_v37  ;;  %1905 = vmatmul.mubr.bf16.vlgmr.msra.gmra.mrb[0].mxu1 %v2054_v24 }
  0x68   : > { %1230 = vmatprep.mubr.bf16.mxu0 %v2237_v41  ;;  %1908 = vmatprep.mubr.bf16.mxu1 %v2055_v25 }
  0x6f   : > { %1231 = vmatmul.mubr.bf16.gmra.mrb[36].mxu0 %v2247_v44  ;;  %1909 = vmatmul.mubr.bf16.gmra.mrb[4].mxu1 %v2056_v26 }
  0x70   : > { %1238 = vmatprep.mubr.bf16.mxu0 %v2263_v49 }
  0x77   : > { %1239 = vmatmul.mubr.bf16.gmra.mrb[40].mxu0 %v2279_v55 }
  0x78   : > { %1246 = vmatprep.mubr.bf16.mxu0 %v2057_v27 }
  0x7f   : > { %1247 = vmatmul.mubr.bf16.gmra.mrb[44].mxu0 %v2059_v28 }
  0xfa   : > { %v1700_v29 = vpop.f32.mrb[0].mxu0 }
  0xfb   : > { %v1701_v30 = vpop.f32.mrb[1].mxu0 }
  0xfc   : > { %v1702_v31 = vadd.f32 %v1701_v30, %v1700_v29  ;;  %v1703_v32 = vpop.f32.mrb[2].mxu0 }
  0xfd   : > { %v1704_v33 = vpop.f32.mrb[3].mxu0 }
  0xfe   : > { %v1705_v34 = vadd.f32 %v1704_v33, %v1703_v32 }
 0x102   : > { %v1706_v35 = vpop.f32.mrb[4].mxu0 }
 0x103   : > { %v1707_v36 = vpop.f32.mrb[5].mxu0 }
 0x104   : > { %v1708_v37 = vadd.f32 %v1707_v36, %v1706_v35  ;;  %v1709_v38 = vpop.f32.mrb[6].mxu0 }
 0x105   : > { %v1710_v39 = vpop.f32.mrb[7].mxu0 }
 0x106   : > { %v1711_v40 = vadd.f32 %v1710_v39, %v1709_v38 }
 0x10a   : > { %v1712_v41 = vpop.f32.mrb[8].mxu0 }
 0x10b   : > { %v1713_v42 = vpop.f32.mrb[9].mxu0 }
 0x10c   : > { %v1714_v43 = vadd.f32 %v1713_v42, %v1712_v41  ;;  %v1715_v44 = vpop.f32.mrb[10].mxu0 }
 0x10d   : > { %v1716_v45 = vpop.f32.mrb[11].mxu0 }
 0x10e   : > { %v1717_v46 = vadd.f32 %v1716_v45, %v1715_v44 }
 0x112   : > { %v1718_v47 = vpop.f32.mrb[12].mxu0 }
 0x113   : > { %v1719_v48 = vpop.f32.mrb[13].mxu0 }
 0x114   : > { %v1720_v49 = vadd.f32 %v1719_v48, %v1718_v47  ;;  %v1721_v50 = vpop.f32.mrb[14].mxu0 }
 0x115   : > { %v1722_v51 = vpop.f32.mrb[15].mxu0 }
 0x116   : > { %v1723_v52 = vadd.f32 %v1722_v51, %v1721_v50 }
 0x11a   : > { %v1752_v53 = vpop.f32.mrb[16].mxu0 }
 0x11b   : > { %v1753_v54 = vpop.f32.mrb[17].mxu0 }
 0x11c   : > { %v1754_v55 = vadd.f32 %v1753_v54, %v1752_v53  ;;  %v1755_v56 = vpop.f32.mrb[18].mxu0 }
 0x11d   : > { %v1756_v57 = vpop.f32.mrb[19].mxu0 }
 0x11e   : > { %v1915_v58 = vadd.f32 %v1754_v55, %v1702_v31  ;;  %v1757_v59 = vadd.f32 %v1756_v57, %v1755_v56 }
 0x120   : > { %v1921_v60 = vadd.f32 %v1757_v59, %v1705_v34  ;;  %v1641_v34 = vld [vmem:[%s2407_s2] ss:$0 sm:$0xff] }
 0x122   : > { %v1758_v61 = vpop.f32.mrb[20].mxu0 }
 0x123   : > { %v1759_v62 = vpop.f32.mrb[21].mxu0 }
 0x124   : > { %v1760_v63 = vadd.f32 %v1759_v62, %v1758_v61  ;;  %v1761_v0 = vpop.f32.mrb[22].mxu0 }
 0x125   : > { %v1762_v1 = vpop.f32.mrb[23].mxu0 }
 0x126   : > { %v1912_v2 = vadd.f32 %v1760_v63, %v1708_v37  ;;  %v1763_v3 = vadd.f32 %v1762_v1, %v1761_v0 }
 0x128   : > { %v1918_v4 = vadd.f32 %v1763_v3, %v1711_v40 }
 0x12a   : > { %v1764_v5 = vpop.f32.mrb[24].mxu0 }
 0x12b   : > { %v1765_v6 = vpop.f32.mrb[25].mxu0 }
 0x12c   : > { %v1766_v7 = vadd.f32 %v1765_v6, %v1764_v5  ;;  %v1767_v8 = vpop.f32.mrb[26].mxu0 }
 0x12d   : > { %v1768_v9 = vpop.f32.mrb[27].mxu0 }
 0x12e   : > { %v1927_v10 = vadd.f32 %v1766_v7, %v1714_v43  ;;  %v1769_v11 = vadd.f32 %v1768_v9, %v1767_v8 }
 0x130   : > { %v1933_v12 = vadd.f32 %v1769_v11, %v1717_v46 }
 0x132   : > { %v1770_v13 = vpop.f32.mrb[28].mxu0 }
 0x133   : > { %v1771_v14 = vpop.f32.mrb[29].mxu0 }
 0x134   : > { %v1772_v15 = vadd.f32 %v1771_v14, %v1770_v13  ;;  %v1773_v16 = vpop.f32.mrb[30].mxu0 }
 0x135   : > { %v1774_v17 = vpop.f32.mrb[31].mxu0 }
 0x136   : > { %v1924_v18 = vadd.f32 %v1772_v15, %v1720_v49  ;;  %v1775_v19 = vadd.f32 %v1774_v17, %v1773_v16 }
 0x138   : > { %v1930_v20 = vadd.f32 %v1775_v19, %v1723_v52 }
 0x13a   : > { %v1804_v21 = vpop.f32.mrb[32].mxu0  ;;  %v1906_v22 = vpop.f32.mrb[0].mxu1 }
 0x13b   : > { %v1805_v23 = vpop.f32.mrb[33].mxu0  ;;  %v1289_v24 = vpop.f32.mrb[1].mxu1 }
 0x13c   : > { %v1806_v25 = vadd.f32 %v1805_v23, %v1804_v21  ;;  %v1807_v26 = vpop.f32.mrb[34].mxu0  ;;  %v1907_v27 = vpop.f32.mrb[2].mxu1 }
 0x13d   : > { %v1808_v28 = vpop.f32.mrb[35].mxu0  ;;  %v1292_v29 = vpop.f32.mrb[3].mxu1 }
 0x13e   : > { %v1916_v30 = vadd.f32 %v1915_v58, %v1806_v25  ;;  %v1809_v31 = vadd.f32 %v1808_v28, %v1807_v26 }
 0x140   : > { %v1917_v32 = vadd.f32 %v1916_v30, %v1289_v24  ;;  %v1922_v33 = vadd.f32 %v1921_v60, %v1809_v31 }
 0x142   : > { %v1923_v35 = vadd.f32 %v1922_v33, %v1292_v29  ;;  %v1810_v36 = vpop.f32.mrb[36].mxu0  ;;  %v1910_v37 = vpop.f32.mrb[4].mxu1  ;;  %v1335_v40 = vadd.f32 %v1917_v32, %v1641_v34 }
 0x143   : > { %v1811_v38 = vpop.f32.mrb[37].mxu0  ;;  %v1305_v39 = vpop.f32.mrb[5].mxu1 }
 0x144   : > { %v1336_v41 = vadd.f32 %v1923_v35, %v1641_v34  ;;  %v1812_v42 = vadd.f32 %v1811_v38, %v1810_v36  ;;  %v1813_v43 = vpop.f32.mrb[38].mxu0  ;;  %v1911_v44 = vpop.f32.mrb[6].mxu1 }
 0x145   : > { %v1814_v45 = vpop.f32.mrb[39].mxu0  ;;  %v1308_v46 = vpop.f32.mrb[7].mxu1 }
 0x146   : > { %v1664_v47 = vpack.c.bf16 %v1336_v41, %v1335_v40  ;;  %v1913_v48 = vadd.f32 %v1912_v2, %v1812_v42  ;;  %v1815_v49 = vadd.f32 %v1814_v45, %v1813_v43 }
 0x148   : > { %1665 = vst [vmem:[%s2396_s20] sm:$0xff] %v1664_v47   ;;  %v1914_v50 = vadd.f32 %v1913_v48, %v1906_v22  ;;  %v1919_v51 = vadd.f32 %v1918_v4, %v1815_v49 }
 0x14a   : > { %v1920_v52 = vadd.f32 %v1919_v51, %v1907_v27  ;;  %v1816_v53 = vpop.f32.mrb[40].mxu0  ;;  %v1337_v55 = vadd.f32 %v1914_v50, %v1641_v34 }
 0x14b   : > { %v1817_v54 = vpop.f32.mrb[41].mxu0 }
 0x14c   : > { %v1338_v56 = vadd.f32 %v1920_v52, %v1641_v34  ;;  %v1818_v57 = vadd.f32 %v1817_v54, %v1816_v53  ;;  %v1819_v58 = vpop.f32.mrb[42].mxu0 }
 0x14d   : > { %v1820_v59 = vpop.f32.mrb[43].mxu0 }
 0x14e   : > { %v1669_v60 = vpack.c.bf16 %v1338_v56, %v1337_v55  ;;  %v1928_v61 = vadd.f32 %v1927_v10, %v1818_v57  ;;  %v1821_v62 = vadd.f32 %v1820_v59, %v1819_v58 }
 0x150   : > { %1681 = vst [vmem:[%s2396_s20 + $0x8] sm:$0xff] %v1669_v60   ;;  %v1929_v63 = vadd.f32 %v1928_v61, %v1305_v39  ;;  %v1934_v0 = vadd.f32 %v1933_v12, %v1821_v62 }
 0x152   : > { %v1935_v1 = vadd.f32 %v1934_v0, %v1308_v46  ;;  %v1822_v2 = vpop.f32.mrb[44].mxu0  ;;  %v1339_v4 = vadd.f32 %v1929_v63, %v1641_v34 }
 0x153   : > { %v1823_v3 = vpop.f32.mrb[45].mxu0 }
 0x154   : > { %v1340_v5 = vadd.f32 %v1935_v1, %v1641_v34  ;;  %v1824_v6 = vadd.f32 %v1823_v3, %v1822_v2  ;;  %v1825_v7 = vpop.f32.mrb[46].mxu0 }
 0x155   : > { %v1826_v8 = vpop.f32.mrb[47].mxu0 }
 0x156   : > { %v1674_v9 = vpack.c.bf16 %v1340_v5, %v1339_v4  ;;  %v1925_v11 = vadd.f32 %v1924_v18, %v1824_v6  ;;  %v1827_v13 = vadd.f32 %v1826_v8, %v1825_v7 }
 0x158   : > { %1682 = vst [vmem:[%s2396_s20 + $0x10] sm:$0xff] %v1674_v9   ;;  %v1926_v14 = vadd.f32 %v1925_v11, %v1910_v37  ;;  %v1931_v10 = vadd.f32 %v1930_v20, %v1827_v13 }
 0x15a   : > { %v1932_v15 = vadd.f32 %v1931_v10, %v1911_v44  ;;  %v1341_v16 = vadd.f32 %v1926_v14, %v1641_v34 }
 0x15c   : > { %v1342_v17 = vadd.f32 %v1932_v15, %v1641_v34 }
 0x15e   : > { %v1679_v19 = vpack.c.bf16 %v1342_v17, %v1341_v16 }
 0x160   : > { %1683 = vst [vmem:[%s2396_s20 + $0x18] sm:$0xff] %v1679_v19  }
 0x161 PF: > { %s13_s12 = sadd.s32 1, %s2066_s12  }
 0x162   : > { %p10_p4 = scmp.ge.s32.totalorder %s13_s12, 4  }
 0x164   :  { %12 = sbr.rel (!%p10_p4) target bundleno = 1 (0x1), region = 64 }

</bundles_post_ra>
